<compile_context>
chip_gen: v7x
topology: tpu7x:2x2x1
jax: 0.10.0
libtpu: 0.0.40
codegen_flags: <defaults>
</compile_context>

<pallas_src>
import jax
import jax.numpy as jnp
from jax.experimental import pallas as pl
from jax.experimental.pallas import tpu as pltpu


# ----------------------------------------------------------------------------
# Fused Pallas kernel: one batch element per grid step, everything in VMEM.
# All node-feature tensors live in transposed (F, N) layout (lane axis = N).
# ----------------------------------------------------------------------------

def _make_gae_kernel(num_layers):
    def kernel(*refs):
        idx = 0
        a_ref = refs[idx]; idx += 1          # (1, N, N)   bf16 adjacency
        st_ref = refs[idx]; idx += 1         # (1, Fin, N) bf16 features, transposed
        w_embed_ref = refs[idx]; idx += 1    # (F0, Fin)   bf16
        b_embed_ref = refs[idx]; idx += 1    # (F0, 1)     f32
        pe_ref = refs[idx]; idx += 1         # (F0, N)     f32  (PE transposed)
        gcn_refs = []
        for _ in range(num_layers):
            gcn_refs.append((refs[idx], refs[idx + 1], refs[idx + 2]))
            idx += 3                          # W^T (3,F_l,F_in_l) bf16, scale (F_l,1), shift (F_l,1)
        wcat_refs = [refs[idx + l] for l in range(num_layers)]; idx += num_layers  # (Fout+Fin, F_l) bf16
        b_seq_ref = refs[idx]; idx += 1      # (Fin, 1) f32
        cmap_ref = refs[idx]; idx += 1       # out: (1, N, N)    f32
        seqt_ref = refs[idx]; idx += 1       # out: (1, Fin, N)  f32 (transposed)

        A = a_ref[0]                          # (N, N)   bf16
        St = st_ref[0]                        # (Fin, N) bf16
        n = A.shape[0]

        # ---- symmetric GCN normalization folded into features (no A_hat/A_norm):
        #      A_norm @ X  ==  s * (A @ (s*X) + s*X),   s = rsqrt(rowsum(A) + 1)
        deg = jnp.sum(A.astype(jnp.float32), axis=0, keepdims=True) + 1.0   # (1, N)
        s = jax.lax.rsqrt(deg)                                              # (1, N)

        # ---- seq_embedd: ReLU(W^T S^T + b) + PE^T   (bias BEFORE the ReLU)
        Ht = jnp.dot(w_embed_ref[...], St, preferred_element_type=jnp.float32)
        Ht = jnp.maximum(Ht + b_embed_ref[...], 0.0) + pe_ref[...]          # (F0, N) f32

        def propagate(Xt):                    # (F, N) f32 -> (F, N) f32
            Xs = Xt * s
            Y = jnp.dot(Xs.astype(jnp.bfloat16), A,
                        preferred_element_type=jnp.float32) + Xs
            return Y * s

        # ---- GCN stack; both decoder projections fused & accumulated per layer
        ncat = wcat_refs[0].shape[0]          # Fout + Fin
        acc = jnp.zeros((ncat, n), jnp.float32)
        for l in range(num_layers):
            wt_ref, scale_ref, shift_ref = gcn_refs[l]
            Hb = Ht.astype(jnp.bfloat16)
            X1 = propagate(Ht)
            X2 = propagate(X1)
            # concat([H, X1, X2]) @ W   ==   W0^T H_t + W1^T X1_t + W2^T X2_t
            Yt = (jnp.dot(wt_ref[0], Hb, preferred_element_type=jnp.float32)
                  + jnp.dot(wt_ref[1], X1.astype(jnp.bfloat16),
                            preferred_element_type=jnp.float32)
                  + jnp.dot(wt_ref[2], X2.astype(jnp.bfloat16),
                            preferred_element_type=jnp.float32))
            Yt = jnp.maximum(Yt * scale_ref[...] + shift_ref[...], 0.0)     # BN(eval)+ReLU
            acc = acc + jnp.dot(wcat_refs[l][...], Yt.astype(jnp.bfloat16),
                                preferred_element_type=jnp.float32)
            Ht = Yt

        f_in = seqt_ref.shape[1]
        f_out = ncat - f_in
        zt = acc[:f_out, :]                              # (Fout, N)
        seqt = acc[f_out:, :] + b_seq_ref[...]           # (Fin,  N)

        # ---- InnerProductDecoder: sigmoid(Z Z^T) via tanh (1 EUP op / element)
        Z = zt.T                                          # (N, Fout) f32, single XLU transpose
        Zb = Z.astype(jnp.bfloat16)
        logits = jax.lax.dot_general(Zb, Zb, (((1,), (1,)), ((), ())),
                                     preferred_element_type=jnp.float32)    # (N, N)
        cmap_ref[0] = 0.5 * jnp.tanh(0.5 * logits) + 0.5

        # ---- seq_decoder: LogSoftmax over the feature (sublane) axis
        m = jnp.max(seqt, axis=0, keepdims=True)
        lse = m + jnp.log(jnp.sum(jnp.exp(seqt - m), axis=0, keepdims=True))
        seqt_ref[0] = seqt - lse

    return kernel


def _const_spec(shape):
    nd = len(shape)
    return pl.BlockSpec(shape, lambda b, _nd=nd: (0,) * _nd)


@jax.jit
def gae_forward(A, S, params, pe):
    B, N, Fin = S.shape
    filters = [lp["W"].shape[2] for lp in params["gcn"]]
    num_layers = len(filters)

    # bf16 storage for the large per-batch operands (halves HBM traffic for A).
    A_b = A.astype(jnp.bfloat16)                               # (B, N, N)
    St = jnp.swapaxes(S, -1, -2).astype(jnp.bfloat16)          # (B, Fin, N)

    # Transposed weights so every in-kernel matmul has an N-lane-wide output.
    W_embed_t = params["W_embed"].T.astype(jnp.bfloat16)       # (F0, Fin)
    b_embed_t = params["b_embed"].T                            # (F0, 1)
    pe_t = pe.T                                                # (F0, N)
    b_seq_t = params["b_seq"].T                                # (Fin, 1)

    # Fuse the two decoder weight matrices column-wise and split per GCN layer,
    # so concat(x) is never materialized and both projections share one matmul.
    w_cat = jnp.concatenate([params["W_dec"], params["W_seq"]], axis=1)  # (Fsum, Fout+Fin)
    offs = [0]
    for f in filters:
        offs.append(offs[-1] + f)
    w_cat_t = [w_cat[offs[l]:offs[l + 1]].T.astype(jnp.bfloat16)         # (Fout+Fin, F_l)
               for l in range(num_layers)]

    inputs = [A_b, St, W_embed_t, b_embed_t, pe_t]
    in_specs = [
        pl.BlockSpec((1, N, N), lambda b: (b, 0, 0)),
        pl.BlockSpec((1, Fin, N), lambda b: (b, 0, 0)),
        _const_spec(W_embed_t.shape),
        _const_spec(b_embed_t.shape),
        _const_spec(pe_t.shape),
    ]
    for lp in params["gcn"]:
        Wt = jnp.swapaxes(lp["W"], 1, 2).astype(jnp.bfloat16)  # (3, F_l, F_in_l)
        scale_t = lp["scale"].T                                # (F_l, 1)
        shift_t = lp["shift"].T                                # (F_l, 1)
        inputs += [Wt, scale_t, shift_t]
        in_specs += [_const_spec(Wt.shape),
                     _const_spec(scale_t.shape),
                     _const_spec(shift_t.shape)]
    for w in w_cat_t:
        inputs.append(w)
        in_specs.append(_const_spec(w.shape))
    inputs.append(b_seq_t)
    in_specs.append(_const_spec(b_seq_t.shape))

    out_shape = (jax.ShapeDtypeStruct((B, N, N), jnp.float32),
                 jax.ShapeDtypeStruct((B, Fin, N), jnp.float32))
    out_specs = (pl.BlockSpec((1, N, N), lambda b: (b, 0, 0)),
                 pl.BlockSpec((1, Fin, N), lambda b: (b, 0, 0)))

    cmap_out, seq_t = pl.pallas_call(
        _make_gae_kernel(num_layers),
        out_shape=out_shape,
        grid=(B,),
        in_specs=in_specs,
        out_specs=out_specs,
        compiler_params=pltpu.CompilerParams(
            dimension_semantics=("parallel",),        # v7x: two TCs split the batch
            vmem_limit_bytes=48 * 1024 * 1024),       # fits under v7x 64 MiB physical
    )(*inputs)

    # Transpose the seq output back to the reference (B, N, Fin) layout once.
    return cmap_out, jnp.swapaxes(seq_t, -1, -2)


# ----------------------------------------------------------------------------
# Parameter setup (plain JAX, done once)
# ----------------------------------------------------------------------------

def sinusoidal_pe(max_len, d_model):
    pos = jnp.arange(max_len, dtype=jnp.float32)[:, None]
    div = jnp.exp(jnp.arange(0, d_model, 2, dtype=jnp.float32)
                  * (-jnp.log(10000.0) / d_model))
    pe = jnp.zeros((max_len, d_model), dtype=jnp.float32)
    pe = pe.at[:, 0::2].set(jnp.sin(pos * div))
    pe = pe.at[:, 1::2].set(jnp.cos(pos * div))
    return pe


def init_params(key, in_features, out_features, filters):
    def linear_w(k, fan_in, shape):
        lim = 1.0 / jnp.sqrt(jnp.float32(fan_in))
        return jax.random.uniform(k, shape, jnp.float32, -lim, lim)

    keys = jax.random.split(key, 8)
    params = {}
    # seq_embedd: Linear(in_features, filters[0]) (bias=True default)
    params["W_embed"] = linear_w(keys[0], in_features, (in_features, filters[0]))
    params["b_embed"] = linear_w(keys[1], in_features, (1, filters[0]))

    # MultiGraphConv stack (bias=False); BN eval-mode default stats folded to scale/shift
    gcn = []
    kgc = jax.random.split(keys[2], len(filters))
    for layer, f in enumerate(filters):
        fin = filters[0] if layer == 0 else filters[layer - 1]
        W = linear_w(kgc[layer], 3 * fin, (3, fin, f))
        eps = 1e-5
        scale = jnp.ones((1, f), jnp.float32) / jnp.sqrt(1.0 + eps)   # gamma / sqrt(var+eps)
        shift = jnp.zeros((1, f), jnp.float32)                        # beta - mean*scale
        gcn.append({"W": W, "scale": scale, "shift": shift})
    params["gcn"] = gcn

    fsum = sum(filters)
    # InnerProductDecoder: Linear(sum(filters), out_features)
    params["W_dec"] = linear_w(keys[3], fsum, (fsum, out_features))
    # seq_decoder: Linear(sum(filters), in_features) + LogSoftmax
    params["W_seq"] = linear_w(keys[4], fsum, (fsum, in_features))
    params["b_seq"] = linear_w(keys[5], fsum, (1, in_features))
    return params


if __name__ == "__main__":
    # Small, self-consistent shapes (in_features == filters[0] so the PE dim
    # matches, exactly as required by the reference forward).
    B, N = 2, 16
    in_features = 32
    out_features = 16
    filters = [32, 32, 32]

    key = jax.random.PRNGKey(0)
    k_a, k_s, k_p = jax.random.split(key, 3)

    # Symmetric binary adjacency (contact map) and node/sequence features
    A_raw = (jax.random.uniform(k_a, (B, N, N)) > 0.7).astype(jnp.float32)
    A = jnp.maximum(A_raw, jnp.swapaxes(A_raw, -1, -2))
    S = jax.random.normal(k_s, (B, N, in_features), jnp.float32)

    params = init_params(k_p, in_features, out_features, filters)
    pe = sinusoidal_pe(N, in_features)

    cmap_out, seq_out = gae_forward(A, S, params, pe)
    jax.block_until_ready((cmap_out, seq_out))

    assert cmap_out.shape == (B, N, N)
    assert seq_out.shape == (B, N, in_features)
    assert bool(jnp.all(jnp.isfinite(cmap_out))) and bool(jnp.all(jnp.isfinite(seq_out)))
    print("KERNEL_OK")
</pallas_src>

<mosaic_0001>
module attributes {stable_mosaic.version = 11 : i64} {
  func.func @kernel(%arg0: i32, %arg1: memref<1x16x16xbf16, #tpu.memory_space<vmem>>, %arg2: memref<1x32x16xbf16, #tpu.memory_space<vmem>>, %arg3: memref<32x32xbf16, #tpu.memory_space<vmem>>, %arg4: memref<32x1xf32, #tpu.memory_space<vmem>>, %arg5: memref<32x16xf32, #tpu.memory_space<vmem>>, %arg6: memref<3x32x32xbf16, #tpu.memory_space<vmem>>, %arg7: memref<32x1xf32, #tpu.memory_space<vmem>>, %arg8: memref<32x1xf32, #tpu.memory_space<vmem>>, %arg9: memref<3x32x32xbf16, #tpu.memory_space<vmem>>, %arg10: memref<32x1xf32, #tpu.memory_space<vmem>>, %arg11: memref<32x1xf32, #tpu.memory_space<vmem>>, %arg12: memref<3x32x32xbf16, #tpu.memory_space<vmem>>, %arg13: memref<32x1xf32, #tpu.memory_space<vmem>>, %arg14: memref<32x1xf32, #tpu.memory_space<vmem>>, %arg15: memref<48x32xbf16, #tpu.memory_space<vmem>>, %arg16: memref<48x32xbf16, #tpu.memory_space<vmem>>, %arg17: memref<48x32xbf16, #tpu.memory_space<vmem>>, %arg18: memref<32x1xf32, #tpu.memory_space<vmem>>, %arg19: memref<1x16x16xf32, #tpu.memory_space<vmem>>, %arg20: memref<1x32x16xf32, #tpu.memory_space<vmem>>) attributes {dimension_semantics = [#tpu.dimension_semantics<parallel>], iteration_bounds = array<i64: 2>, scalar_prefetch = 0 : i64, scratch_operands = 0 : i64, tpu.core_type = #tpu.core_type<tc>, window_params = [{transform_indices = @transform_0, window_bounds = array<i64: 1, 16, 16>}, {transform_indices = @transform_1, window_bounds = array<i64: 1, 32, 16>}, {pipeline_mode = #tpu.pipeline_mode<synchronous>, transform_indices = @transform_2, window_bounds = array<i64: 32, 32>}, {pipeline_mode = #tpu.pipeline_mode<synchronous>, transform_indices = @transform_3, window_bounds = array<i64: 32, 1>}, {pipeline_mode = #tpu.pipeline_mode<synchronous>, transform_indices = @transform_4, window_bounds = array<i64: 32, 16>}, {pipeline_mode = #tpu.pipeline_mode<synchronous>, transform_indices = @transform_5, window_bounds = array<i64: 3, 32, 32>}, {pipeline_mode = #tpu.pipeline_mode<synchronous>, transform_indices = @transform_6, window_bounds = array<i64: 32, 1>}, {pipeline_mode = #tpu.pipeline_mode<synchronous>, transform_indices = @transform_7, window_bounds = array<i64: 32, 1>}, {pipeline_mode = #tpu.pipeline_mode<synchronous>, transform_indices = @transform_8, window_bounds = array<i64: 3, 32, 32>}, {pipeline_mode = #tpu.pipeline_mode<synchronous>, transform_indices = @transform_9, window_bounds = array<i64: 32, 1>}, {pipeline_mode = #tpu.pipeline_mode<synchronous>, transform_indices = @transform_10, window_bounds = array<i64: 32, 1>}, {pipeline_mode = #tpu.pipeline_mode<synchronous>, transform_indices = @transform_11, window_bounds = array<i64: 3, 32, 32>}, {pipeline_mode = #tpu.pipeline_mode<synchronous>, transform_indices = @transform_12, window_bounds = array<i64: 32, 1>}, {pipeline_mode = #tpu.pipeline_mode<synchronous>, transform_indices = @transform_13, window_bounds = array<i64: 32, 1>}, {pipeline_mode = #tpu.pipeline_mode<synchronous>, transform_indices = @transform_14, window_bounds = array<i64: 48, 32>}, {pipeline_mode = #tpu.pipeline_mode<synchronous>, transform_indices = @transform_15, window_bounds = array<i64: 48, 32>}, {pipeline_mode = #tpu.pipeline_mode<synchronous>, transform_indices = @transform_16, window_bounds = array<i64: 48, 32>}, {pipeline_mode = #tpu.pipeline_mode<synchronous>, transform_indices = @transform_17, window_bounds = array<i64: 32, 1>}, {transform_indices = @transform_18, window_bounds = array<i64: 1, 16, 16>}, {transform_indices = @transform_19, window_bounds = array<i64: 1, 32, 16>}]} {
    %c0 = arith.constant 0 : index
    %c0_0 = arith.constant 0 : index
    %c0_1 = arith.constant 0 : index
    %0 = vector.load %arg1[%c0, %c0_0, %c0_1] : memref<1x16x16xbf16, #tpu.memory_space<vmem>>, vector<1x16x16xbf16>
    %1 = vector.shape_cast %0 : vector<1x16x16xbf16> to vector<16x16xbf16>
    %c0_2 = arith.constant 0 : index
    %c0_3 = arith.constant 0 : index
    %c0_4 = arith.constant 0 : index
    %2 = vector.load %arg2[%c0_2, %c0_3, %c0_4] : memref<1x32x16xbf16, #tpu.memory_space<vmem>>, vector<1x32x16xbf16>
    %3 = vector.shape_cast %2 : vector<1x32x16xbf16> to vector<32x16xbf16>
    %4 = arith.extf %1 : vector<16x16xbf16> to vector<16x16xf32>
    %cst = arith.constant dense<0.000000e+00> : vector<16xf32>
    %5 = vector.multi_reduction <add>, %4, %cst [0] : vector<16x16xf32> to vector<16xf32>
    %6 = vector.shape_cast %5 : vector<16xf32> to vector<1x16xf32>
    %cst_5 = arith.constant 1.000000e+00 : f32
    %7 = vector.broadcast %cst_5 : f32 to vector<1x16xf32>
    %8 = arith.addf %6, %7 : vector<1x16xf32>
    %9 = math.rsqrt %8 : vector<1x16xf32>
    %c0_6 = arith.constant 0 : index
    %c0_7 = arith.constant 0 : index
    %10 = vector.load %arg3[%c0_6, %c0_7] : memref<32x32xbf16, #tpu.memory_space<vmem>>, vector<32x32xbf16>
    %cst_8 = arith.constant dense<0.000000e+00> : vector<32x16xf32>
    %11 = tpu.matmul %10, %3, %cst_8 {dimension_numbers = #tpu.dot_dimension_numbers<[1], [0], [0], [1], [0, 0, 1, 1], [], []>} : vector<32x32xbf16>, vector<32x16xbf16>, vector<32x16xf32> -> vector<32x16xf32>
    %c0_9 = arith.constant 0 : index
    %c0_10 = arith.constant 0 : index
    %12 = vector.load %arg4[%c0_9, %c0_10] : memref<32x1xf32, #tpu.memory_space<vmem>>, vector<32x1xf32>
    %13 = vector.broadcast %12 : vector<32x1xf32> to vector<32x16xf32>
    %14 = arith.addf %11, %13 : vector<32x16xf32>
    %cst_11 = arith.constant 0.000000e+00 : f32
    %15 = vector.broadcast %cst_11 : f32 to vector<32x16xf32>
    %16 = arith.maximumf %14, %15 : vector<32x16xf32>
    %c0_12 = arith.constant 0 : index
    %c0_13 = arith.constant 0 : index
    %17 = vector.load %arg5[%c0_12, %c0_13] : memref<32x16xf32, #tpu.memory_space<vmem>>, vector<32x16xf32>
    %18 = arith.addf %16, %17 : vector<32x16xf32>
    %cst_14 = arith.constant 0.000000e+00 : f32
    %19 = vector.broadcast %cst_14 : f32 to vector<48x16xf32>
    %20 = arith.truncf %18 : vector<32x16xf32> to vector<32x16xbf16>
    %21 = vector.broadcast %9 : vector<1x16xf32> to vector<32x16xf32>
    %22 = arith.mulf %18, %21 : vector<32x16xf32>
    %23 = arith.truncf %22 : vector<32x16xf32> to vector<32x16xbf16>
    %cst_15 = arith.constant dense<0.000000e+00> : vector<32x16xf32>
    %24 = tpu.matmul %23, %1, %cst_15 {dimension_numbers = #tpu.dot_dimension_numbers<[1], [0], [0], [1], [0, 0, 1, 1], [], []>} : vector<32x16xbf16>, vector<16x16xbf16>, vector<32x16xf32> -> vector<32x16xf32>
    %25 = arith.addf %24, %22 : vector<32x16xf32>
    %26 = vector.broadcast %9 : vector<1x16xf32> to vector<32x16xf32>
    %27 = arith.mulf %25, %26 : vector<32x16xf32>
    %28 = vector.broadcast %9 : vector<1x16xf32> to vector<32x16xf32>
    %29 = arith.mulf %27, %28 : vector<32x16xf32>
    %30 = arith.truncf %29 : vector<32x16xf32> to vector<32x16xbf16>
    %cst_16 = arith.constant dense<0.000000e+00> : vector<32x16xf32>
    %31 = tpu.matmul %30, %1, %cst_16 {dimension_numbers = #tpu.dot_dimension_numbers<[1], [0], [0], [1], [0, 0, 1, 1], [], []>} : vector<32x16xbf16>, vector<16x16xbf16>, vector<32x16xf32> -> vector<32x16xf32>
    %32 = arith.addf %31, %29 : vector<32x16xf32>
    %33 = vector.broadcast %9 : vector<1x16xf32> to vector<32x16xf32>
    %34 = arith.mulf %32, %33 : vector<32x16xf32>
    %c0_17 = arith.constant 0 : index
    %c0_18 = arith.constant 0 : index
    %c0_19 = arith.constant 0 : index
    %35 = vector.load %arg6[%c0_17, %c0_18, %c0_19] : memref<3x32x32xbf16, #tpu.memory_space<vmem>>, vector<1x32x32xbf16>
    %36 = vector.shape_cast %35 : vector<1x32x32xbf16> to vector<32x32xbf16>
    %cst_20 = arith.constant dense<0.000000e+00> : vector<32x16xf32>
    %37 = tpu.matmul %36, %20, %cst_20 {dimension_numbers = #tpu.dot_dimension_numbers<[1], [0], [0], [1], [0, 0, 1, 1], [], []>} : vector<32x32xbf16>, vector<32x16xbf16>, vector<32x16xf32> -> vector<32x16xf32>
    %c1 = arith.constant 1 : index
    %c0_21 = arith.constant 0 : index
    %c0_22 = arith.constant 0 : index
    %38 = vector.load %arg6[%c1, %c0_21, %c0_22] : memref<3x32x32xbf16, #tpu.memory_space<vmem>>, vector<1x32x32xbf16>
    %39 = vector.shape_cast %38 : vector<1x32x32xbf16> to vector<32x32xbf16>
    %40 = arith.truncf %27 : vector<32x16xf32> to vector<32x16xbf16>
    %cst_23 = arith.constant dense<0.000000e+00> : vector<32x16xf32>
    %41 = tpu.matmul %39, %40, %cst_23 {dimension_numbers = #tpu.dot_dimension_numbers<[1], [0], [0], [1], [0, 0, 1, 1], [], []>} : vector<32x32xbf16>, vector<32x16xbf16>, vector<32x16xf32> -> vector<32x16xf32>
    %42 = arith.addf %37, %41 : vector<32x16xf32>
    %c2 = arith.constant 2 : index
    %c0_24 = arith.constant 0 : index
    %c0_25 = arith.constant 0 : index
    %43 = vector.load %arg6[%c2, %c0_24, %c0_25] : memref<3x32x32xbf16, #tpu.memory_space<vmem>>, vector<1x32x32xbf16>
    %44 = vector.shape_cast %43 : vector<1x32x32xbf16> to vector<32x32xbf16>
    %45 = arith.truncf %34 : vector<32x16xf32> to vector<32x16xbf16>
    %cst_26 = arith.constant dense<0.000000e+00> : vector<32x16xf32>
    %46 = tpu.matmul %44, %45, %cst_26 {dimension_numbers = #tpu.dot_dimension_numbers<[1], [0], [0], [1], [0, 0, 1, 1], [], []>} : vector<32x32xbf16>, vector<32x16xbf16>, vector<32x16xf32> -> vector<32x16xf32>
    %47 = arith.addf %42, %46 : vector<32x16xf32>
    %c0_27 = arith.constant 0 : index
    %c0_28 = arith.constant 0 : index
    %48 = vector.load %arg7[%c0_27, %c0_28] : memref<32x1xf32, #tpu.memory_space<vmem>>, vector<32x1xf32>
    %49 = vector.broadcast %48 : vector<32x1xf32> to vector<32x16xf32>
    %50 = arith.mulf %47, %49 : vector<32x16xf32>
    %c0_29 = arith.constant 0 : index
    %c0_30 = arith.constant 0 : index
    %51 = vector.load %arg8[%c0_29, %c0_30] : memref<32x1xf32, #tpu.memory_space<vmem>>, vector<32x1xf32>
    %52 = vector.broadcast %51 : vector<32x1xf32> to vector<32x16xf32>
    %53 = arith.addf %50, %52 : vector<32x16xf32>
    %cst_31 = arith.constant 0.000000e+00 : f32
    %54 = vector.broadcast %cst_31 : f32 to vector<32x16xf32>
    %55 = arith.maximumf %53, %54 : vector<32x16xf32>
    %c0_32 = arith.constant 0 : index
    %c0_33 = arith.constant 0 : index
    %56 = vector.load %arg15[%c0_32, %c0_33] : memref<48x32xbf16, #tpu.memory_space<vmem>>, vector<48x32xbf16>
    %57 = arith.truncf %55 : vector<32x16xf32> to vector<32x16xbf16>
    %cst_34 = arith.constant dense<0.000000e+00> : vector<48x16xf32>
    %58 = tpu.matmul %56, %57, %cst_34 {dimension_numbers = #tpu.dot_dimension_numbers<[1], [0], [0], [1], [0, 0, 1, 1], [], []>} : vector<48x32xbf16>, vector<32x16xbf16>, vector<48x16xf32> -> vector<48x16xf32>
    %59 = arith.addf %19, %58 : vector<48x16xf32>
    %60 = arith.truncf %55 : vector<32x16xf32> to vector<32x16xbf16>
    %61 = vector.broadcast %9 : vector<1x16xf32> to vector<32x16xf32>
    %62 = arith.mulf %55, %61 : vector<32x16xf32>
    %63 = arith.truncf %62 : vector<32x16xf32> to vector<32x16xbf16>
    %cst_35 = arith.constant dense<0.000000e+00> : vector<32x16xf32>
    %64 = tpu.matmul %63, %1, %cst_35 {dimension_numbers = #tpu.dot_dimension_numbers<[1], [0], [0], [1], [0, 0, 1, 1], [], []>} : vector<32x16xbf16>, vector<16x16xbf16>, vector<32x16xf32> -> vector<32x16xf32>
    %65 = arith.addf %64, %62 : vector<32x16xf32>
    %66 = vector.broadcast %9 : vector<1x16xf32> to vector<32x16xf32>
    %67 = arith.mulf %65, %66 : vector<32x16xf32>
    %68 = vector.broadcast %9 : vector<1x16xf32> to vector<32x16xf32>
    %69 = arith.mulf %67, %68 : vector<32x16xf32>
    %70 = arith.truncf %69 : vector<32x16xf32> to vector<32x16xbf16>
    %cst_36 = arith.constant dense<0.000000e+00> : vector<32x16xf32>
    %71 = tpu.matmul %70, %1, %cst_36 {dimension_numbers = #tpu.dot_dimension_numbers<[1], [0], [0], [1], [0, 0, 1, 1], [], []>} : vector<32x16xbf16>, vector<16x16xbf16>, vector<32x16xf32> -> vector<32x16xf32>
    %72 = arith.addf %71, %69 : vector<32x16xf32>
    %73 = vector.broadcast %9 : vector<1x16xf32> to vector<32x16xf32>
    %74 = arith.mulf %72, %73 : vector<32x16xf32>
    %c0_37 = arith.constant 0 : index
    %c0_38 = arith.constant 0 : index
    %c0_39 = arith.constant 0 : index
    %75 = vector.load %arg9[%c0_37, %c0_38, %c0_39] : memref<3x32x32xbf16, #tpu.memory_space<vmem>>, vector<1x32x32xbf16>
    %76 = vector.shape_cast %75 : vector<1x32x32xbf16> to vector<32x32xbf16>
    %cst_40 = arith.constant dense<0.000000e+00> : vector<32x16xf32>
    %77 = tpu.matmul %76, %60, %cst_40 {dimension_numbers = #tpu.dot_dimension_numbers<[1], [0], [0], [1], [0, 0, 1, 1], [], []>} : vector<32x32xbf16>, vector<32x16xbf16>, vector<32x16xf32> -> vector<32x16xf32>
    %c1_41 = arith.constant 1 : index
    %c0_42 = arith.constant 0 : index
    %c0_43 = arith.constant 0 : index
    %78 = vector.load %arg9[%c1_41, %c0_42, %c0_43] : memref<3x32x32xbf16, #tpu.memory_space<vmem>>, vector<1x32x32xbf16>
    %79 = vector.shape_cast %78 : vector<1x32x32xbf16> to vector<32x32xbf16>
    %80 = arith.truncf %67 : vector<32x16xf32> to vector<32x16xbf16>
    %cst_44 = arith.constant dense<0.000000e+00> : vector<32x16xf32>
    %81 = tpu.matmul %79, %80, %cst_44 {dimension_numbers = #tpu.dot_dimension_numbers<[1], [0], [0], [1], [0, 0, 1, 1], [], []>} : vector<32x32xbf16>, vector<32x16xbf16>, vector<32x16xf32> -> vector<32x16xf32>
    %82 = arith.addf %77, %81 : vector<32x16xf32>
    %c2_45 = arith.constant 2 : index
    %c0_46 = arith.constant 0 : index
    %c0_47 = arith.constant 0 : index
    %83 = vector.load %arg9[%c2_45, %c0_46, %c0_47] : memref<3x32x32xbf16, #tpu.memory_space<vmem>>, vector<1x32x32xbf16>
    %84 = vector.shape_cast %83 : vector<1x32x32xbf16> to vector<32x32xbf16>
    %85 = arith.truncf %74 : vector<32x16xf32> to vector<32x16xbf16>
    %cst_48 = arith.constant dense<0.000000e+00> : vector<32x16xf32>
    %86 = tpu.matmul %84, %85, %cst_48 {dimension_numbers = #tpu.dot_dimension_numbers<[1], [0], [0], [1], [0, 0, 1, 1], [], []>} : vector<32x32xbf16>, vector<32x16xbf16>, vector<32x16xf32> -> vector<32x16xf32>
    %87 = arith.addf %82, %86 : vector<32x16xf32>
    %c0_49 = arith.constant 0 : index
    %c0_50 = arith.constant 0 : index
    %88 = vector.load %arg10[%c0_49, %c0_50] : memref<32x1xf32, #tpu.memory_space<vmem>>, vector<32x1xf32>
    %89 = vector.broadcast %88 : vector<32x1xf32> to vector<32x16xf32>
    %90 = arith.mulf %87, %89 : vector<32x16xf32>
    %c0_51 = arith.constant 0 : index
    %c0_52 = arith.constant 0 : index
    %91 = vector.load %arg11[%c0_51, %c0_52] : memref<32x1xf32, #tpu.memory_space<vmem>>, vector<32x1xf32>
    %92 = vector.broadcast %91 : vector<32x1xf32> to vector<32x16xf32>
    %93 = arith.addf %90, %92 : vector<32x16xf32>
    %cst_53 = arith.constant 0.000000e+00 : f32
    %94 = vector.broadcast %cst_53 : f32 to vector<32x16xf32>
    %95 = arith.maximumf %93, %94 : vector<32x16xf32>
    %c0_54 = arith.constant 0 : index
    %c0_55 = arith.constant 0 : index
    %96 = vector.load %arg16[%c0_54, %c0_55] : memref<48x32xbf16, #tpu.memory_space<vmem>>, vector<48x32xbf16>
    %97 = arith.truncf %95 : vector<32x16xf32> to vector<32x16xbf16>
    %cst_56 = arith.constant dense<0.000000e+00> : vector<48x16xf32>
    %98 = tpu.matmul %96, %97, %cst_56 {dimension_numbers = #tpu.dot_dimension_numbers<[1], [0], [0], [1], [0, 0, 1, 1], [], []>} : vector<48x32xbf16>, vector<32x16xbf16>, vector<48x16xf32> -> vector<48x16xf32>
    %99 = arith.addf %59, %98 : vector<48x16xf32>
    %100 = arith.truncf %95 : vector<32x16xf32> to vector<32x16xbf16>
    %101 = vector.broadcast %9 : vector<1x16xf32> to vector<32x16xf32>
    %102 = arith.mulf %95, %101 : vector<32x16xf32>
    %103 = arith.truncf %102 : vector<32x16xf32> to vector<32x16xbf16>
    %cst_57 = arith.constant dense<0.000000e+00> : vector<32x16xf32>
    %104 = tpu.matmul %103, %1, %cst_57 {dimension_numbers = #tpu.dot_dimension_numbers<[1], [0], [0], [1], [0, 0, 1, 1], [], []>} : vector<32x16xbf16>, vector<16x16xbf16>, vector<32x16xf32> -> vector<32x16xf32>
    %105 = arith.addf %104, %102 : vector<32x16xf32>
    %106 = vector.broadcast %9 : vector<1x16xf32> to vector<32x16xf32>
    %107 = arith.mulf %105, %106 : vector<32x16xf32>
    %108 = vector.broadcast %9 : vector<1x16xf32> to vector<32x16xf32>
    %109 = arith.mulf %107, %108 : vector<32x16xf32>
    %110 = arith.truncf %109 : vector<32x16xf32> to vector<32x16xbf16>
    %cst_58 = arith.constant dense<0.000000e+00> : vector<32x16xf32>
    %111 = tpu.matmul %110, %1, %cst_58 {dimension_numbers = #tpu.dot_dimension_numbers<[1], [0], [0], [1], [0, 0, 1, 1], [], []>} : vector<32x16xbf16>, vector<16x16xbf16>, vector<32x16xf32> -> vector<32x16xf32>
    %112 = arith.addf %111, %109 : vector<32x16xf32>
    %113 = vector.broadcast %9 : vector<1x16xf32> to vector<32x16xf32>
    %114 = arith.mulf %112, %113 : vector<32x16xf32>
    %c0_59 = arith.constant 0 : index
    %c0_60 = arith.constant 0 : index
    %c0_61 = arith.constant 0 : index
    %115 = vector.load %arg12[%c0_59, %c0_60, %c0_61] : memref<3x32x32xbf16, #tpu.memory_space<vmem>>, vector<1x32x32xbf16>
    %116 = vector.shape_cast %115 : vector<1x32x32xbf16> to vector<32x32xbf16>
    %cst_62 = arith.constant dense<0.000000e+00> : vector<32x16xf32>
    %117 = tpu.matmul %116, %100, %cst_62 {dimension_numbers = #tpu.dot_dimension_numbers<[1], [0], [0], [1], [0, 0, 1, 1], [], []>} : vector<32x32xbf16>, vector<32x16xbf16>, vector<32x16xf32> -> vector<32x16xf32>
    %c1_63 = arith.constant 1 : index
    %c0_64 = arith.constant 0 : index
    %c0_65 = arith.constant 0 : index
    %118 = vector.load %arg12[%c1_63, %c0_64, %c0_65] : memref<3x32x32xbf16, #tpu.memory_space<vmem>>, vector<1x32x32xbf16>
    %119 = vector.shape_cast %118 : vector<1x32x32xbf16> to vector<32x32xbf16>
    %120 = arith.truncf %107 : vector<32x16xf32> to vector<32x16xbf16>
    %cst_66 = arith.constant dense<0.000000e+00> : vector<32x16xf32>
    %121 = tpu.matmul %119, %120, %cst_66 {dimension_numbers = #tpu.dot_dimension_numbers<[1], [0], [0], [1], [0, 0, 1, 1], [], []>} : vector<32x32xbf16>, vector<32x16xbf16>, vector<32x16xf32> -> vector<32x16xf32>
    %122 = arith.addf %117, %121 : vector<32x16xf32>
    %c2_67 = arith.constant 2 : index
    %c0_68 = arith.constant 0 : index
    %c0_69 = arith.constant 0 : index
    %123 = vector.load %arg12[%c2_67, %c0_68, %c0_69] : memref<3x32x32xbf16, #tpu.memory_space<vmem>>, vector<1x32x32xbf16>
    %124 = vector.shape_cast %123 : vector<1x32x32xbf16> to vector<32x32xbf16>
    %125 = arith.truncf %114 : vector<32x16xf32> to vector<32x16xbf16>
    %cst_70 = arith.constant dense<0.000000e+00> : vector<32x16xf32>
    %126 = tpu.matmul %124, %125, %cst_70 {dimension_numbers = #tpu.dot_dimension_numbers<[1], [0], [0], [1], [0, 0, 1, 1], [], []>} : vector<32x32xbf16>, vector<32x16xbf16>, vector<32x16xf32> -> vector<32x16xf32>
    %127 = arith.addf %122, %126 : vector<32x16xf32>
    %c0_71 = arith.constant 0 : index
    %c0_72 = arith.constant 0 : index
    %128 = vector.load %arg13[%c0_71, %c0_72] : memref<32x1xf32, #tpu.memory_space<vmem>>, vector<32x1xf32>
    %129 = vector.broadcast %128 : vector<32x1xf32> to vector<32x16xf32>
    %130 = arith.mulf %127, %129 : vector<32x16xf32>
    %c0_73 = arith.constant 0 : index
    %c0_74 = arith.constant 0 : index
    %131 = vector.load %arg14[%c0_73, %c0_74] : memref<32x1xf32, #tpu.memory_space<vmem>>, vector<32x1xf32>
    %132 = vector.broadcast %131 : vector<32x1xf32> to vector<32x16xf32>
    %133 = arith.addf %130, %132 : vector<32x16xf32>
    %cst_75 = arith.constant 0.000000e+00 : f32
    %134 = vector.broadcast %cst_75 : f32 to vector<32x16xf32>
    %135 = arith.maximumf %133, %134 : vector<32x16xf32>
    %c0_76 = arith.constant 0 : index
    %c0_77 = arith.constant 0 : index
    %136 = vector.load %arg17[%c0_76, %c0_77] : memref<48x32xbf16, #tpu.memory_space<vmem>>, vector<48x32xbf16>
    %137 = arith.truncf %135 : vector<32x16xf32> to vector<32x16xbf16>
    %cst_78 = arith.constant dense<0.000000e+00> : vector<48x16xf32>
    %138 = tpu.matmul %136, %137, %cst_78 {dimension_numbers = #tpu.dot_dimension_numbers<[1], [0], [0], [1], [0, 0, 1, 1], [], []>} : vector<48x32xbf16>, vector<32x16xbf16>, vector<48x16xf32> -> vector<48x16xf32>
    %139 = arith.addf %99, %138 : vector<48x16xf32>
    %140 = vector.extract_strided_slice %139 {offsets = [0, 0], sizes = [16, 16], strides = [1, 1]} : vector<48x16xf32> to vector<16x16xf32>
    %141 = vector.extract_strided_slice %139 {offsets = [16, 0], sizes = [32, 16], strides = [1, 1]} : vector<48x16xf32> to vector<32x16xf32>
    %c0_79 = arith.constant 0 : index
    %c0_80 = arith.constant 0 : index
    %142 = vector.load %arg18[%c0_79, %c0_80] : memref<32x1xf32, #tpu.memory_space<vmem>>, vector<32x1xf32>
    %143 = vector.broadcast %142 : vector<32x1xf32> to vector<32x16xf32>
    %144 = arith.addf %141, %143 : vector<32x16xf32>
    %145 = tpu.transpose %140, [1, 0] : vector<16x16xf32> -> vector<16x16xf32>
    %146 = arith.truncf %145 : vector<16x16xf32> to vector<16x16xbf16>
    %cst_81 = arith.constant dense<0.000000e+00> : vector<16x16xf32>
    %147 = tpu.matmul %146, %146, %cst_81 {dimension_numbers = #tpu.dot_dimension_numbers<[1], [1], [0], [0], [0, 0, 1, 0], [], []>} : vector<16x16xbf16>, vector<16x16xbf16>, vector<16x16xf32> -> vector<16x16xf32>
    %cst_82 = arith.constant 5.000000e-01 : f32
    %148 = vector.broadcast %cst_82 : f32 to vector<16x16xf32>
    %149 = arith.mulf %148, %147 : vector<16x16xf32>
    %150 = math.tanh %149 : vector<16x16xf32>
    %cst_83 = arith.constant 5.000000e-01 : f32
    %151 = vector.broadcast %cst_83 : f32 to vector<16x16xf32>
    %152 = arith.mulf %151, %150 : vector<16x16xf32>
    %cst_84 = arith.constant 5.000000e-01 : f32
    %153 = vector.broadcast %cst_84 : f32 to vector<16x16xf32>
    %154 = arith.addf %152, %153 : vector<16x16xf32>
    %c0_85 = arith.constant 0 : index
    %c0_86 = arith.constant 0 : index
    %c0_87 = arith.constant 0 : index
    %155 = vector.load %arg19[%c0_85, %c0_86, %c0_87] : memref<1x16x16xf32, #tpu.memory_space<vmem>>, vector<1x16x16xf32>
    %156 = vector.shape_cast %155 : vector<1x16x16xf32> to vector<16x16xf32>
    %157 = vector.shape_cast %154 : vector<16x16xf32> to vector<1x16x16xf32>
    tpu.vector_store %arg19[%c0_85, %c0_86, %c0_87], %157 {strides = array<i32>} : memref<1x16x16xf32, #tpu.memory_space<vmem>>, vector<1x16x16xf32>,
    %cst_88 = arith.constant dense<0xFF800000> : vector<16xf32>
    %158 = vector.multi_reduction <maximumf>, %144, %cst_88 [0] : vector<32x16xf32> to vector<16xf32>
    %159 = vector.shape_cast %158 : vector<16xf32> to vector<1x16xf32>
    %160 = vector.broadcast %159 : vector<1x16xf32> to vector<32x16xf32>
    %161 = arith.subf %144, %160 : vector<32x16xf32>
    %162 = math.exp %161 : vector<32x16xf32>
    %cst_89 = arith.constant dense<0.000000e+00> : vector<16xf32>
    %163 = vector.multi_reduction <add>, %162, %cst_89 [0] : vector<32x16xf32> to vector<16xf32>
    %164 = vector.shape_cast %163 : vector<16xf32> to vector<1x16xf32>
    %165 = math.log %164 : vector<1x16xf32>
    %166 = arith.addf %159, %165 : vector<1x16xf32>
    %167 = vector.broadcast %166 : vector<1x16xf32> to vector<32x16xf32>
    %168 = arith.subf %144, %167 : vector<32x16xf32>
    %c0_90 = arith.constant 0 : index
    %c0_91 = arith.constant 0 : index
    %c0_92 = arith.constant 0 : index
    %169 = vector.load %arg20[%c0_90, %c0_91, %c0_92] : memref<1x32x16xf32, #tpu.memory_space<vmem>>, vector<1x32x16xf32>
    %170 = vector.shape_cast %169 : vector<1x32x16xf32> to vector<32x16xf32>
    %171 = vector.shape_cast %168 : vector<32x16xf32> to vector<1x32x16xf32>
    tpu.vector_store %arg20[%c0_90, %c0_91, %c0_92], %171 {strides = array<i32>} : memref<1x32x16xf32, #tpu.memory_space<vmem>>, vector<1x32x16xf32>,
    return
  }
  func.func @transform_0(%arg0: i32) -> (i32, i32, i32) {
    %c0_i32 = arith.constant 0 : i32
    %c0_i32_0 = arith.constant 0 : i32
    %c0_i32_1 = arith.constant 0 : i32
    return %arg0, %c0_i32, %c0_i32_0 : i32, i32, i32
  }
  func.func @transform_1(%arg0: i32) -> (i32, i32, i32) {
    %c0_i32 = arith.constant 0 : i32
    %c0_i32_0 = arith.constant 0 : i32
    %c0_i32_1 = arith.constant 0 : i32
    return %arg0, %c0_i32, %c0_i32_0 : i32, i32, i32
  }
  func.func @transform_2(%arg0: i32) -> (i32, i32) {
    %c0_i32 = arith.constant 0 : i32
    %c0_i32_0 = arith.constant 0 : i32
    %c0_i32_1 = arith.constant 0 : i32
    return %c0_i32, %c0_i32_0 : i32, i32
  }
  func.func @transform_3(%arg0: i32) -> (i32, i32) {
    %c0_i32 = arith.constant 0 : i32
    %c0_i32_0 = arith.constant 0 : i32
    %c0_i32_1 = arith.constant 0 : i32
    return %c0_i32, %c0_i32_0 : i32, i32
  }
  func.func @transform_4(%arg0: i32) -> (i32, i32) {
    %c0_i32 = arith.constant 0 : i32
    %c0_i32_0 = arith.constant 0 : i32
    %c0_i32_1 = arith.constant 0 : i32
    return %c0_i32, %c0_i32_0 : i32, i32
  }
  func.func @transform_5(%arg0: i32) -> (i32, i32, i32) {
    %c0_i32 = arith.constant 0 : i32
    %c0_i32_0 = arith.constant 0 : i32
    %c0_i32_1 = arith.constant 0 : i32
    %c0_i32_2 = arith.constant 0 : i32
    return %c0_i32, %c0_i32_0, %c0_i32_1 : i32, i32, i32
  }
  func.func @transform_6(%arg0: i32) -> (i32, i32) {
    %c0_i32 = arith.constant 0 : i32
    %c0_i32_0 = arith.constant 0 : i32
    %c0_i32_1 = arith.constant 0 : i32
    return %c0_i32, %c0_i32_0 : i32, i32
  }
  func.func @transform_7(%arg0: i32) -> (i32, i32) {
    %c0_i32 = arith.constant 0 : i32
    %c0_i32_0 = arith.constant 0 : i32
    %c0_i32_1 = arith.constant 0 : i32
    return %c0_i32, %c0_i32_0 : i32, i32
  }
  func.func @transform_8(%arg0: i32) -> (i32, i32, i32) {
    %c0_i32 = arith.constant 0 : i32
    %c0_i32_0 = arith.constant 0 : i32
    %c0_i32_1 = arith.constant 0 : i32
    %c0_i32_2 = arith.constant 0 : i32
    return %c0_i32, %c0_i32_0, %c0_i32_1 : i32, i32, i32
  }
  func.func @transform_9(%arg0: i32) -> (i32, i32) {
    %c0_i32 = arith.constant 0 : i32
    %c0_i32_0 = arith.constant 0 : i32
    %c0_i32_1 = arith.constant 0 : i32
    return %c0_i32, %c0_i32_0 : i32, i32
  }
  func.func @transform_10(%arg0: i32) -> (i32, i32) {
    %c0_i32 = arith.constant 0 : i32
    %c0_i32_0 = arith.constant 0 : i32
    %c0_i32_1 = arith.constant 0 : i32
    return %c0_i32, %c0_i32_0 : i32, i32
  }
  func.func @transform_11(%arg0: i32) -> (i32, i32, i32) {
    %c0_i32 = arith.constant 0 : i32
    %c0_i32_0 = arith.constant 0 : i32
    %c0_i32_1 = arith.constant 0 : i32
    %c0_i32_2 = arith.constant 0 : i32
    return %c0_i32, %c0_i32_0, %c0_i32_1 : i32, i32, i32
  }
  func.func @transform_12(%arg0: i32) -> (i32, i32) {
    %c0_i32 = arith.constant 0 : i32
    %c0_i32_0 = arith.constant 0 : i32
    %c0_i32_1 = arith.constant 0 : i32
    return %c0_i32, %c0_i32_0 : i32, i32
  }
  func.func @transform_13(%arg0: i32) -> (i32, i32) {
    %c0_i32 = arith.constant 0 : i32
    %c0_i32_0 = arith.constant 0 : i32
    %c0_i32_1 = arith.constant 0 : i32
    return %c0_i32, %c0_i32_0 : i32, i32
  }
  func.func @transform_14(%arg0: i32) -> (i32, i32) {
    %c0_i32 = arith.constant 0 : i32
    %c0_i32_0 = arith.constant 0 : i32
    %c0_i32_1 = arith.constant 0 : i32
    return %c0_i32, %c0_i32_0 : i32, i32
  }
  func.func @transform_15(%arg0: i32) -> (i32, i32) {
    %c0_i32 = arith.constant 0 : i32
    %c0_i32_0 = arith.constant 0 : i32
    %c0_i32_1 = arith.constant 0 : i32
    return %c0_i32, %c0_i32_0 : i32, i32
  }
  func.func @transform_16(%arg0: i32) -> (i32, i32) {
    %c0_i32 = arith.constant 0 : i32
    %c0_i32_0 = arith.constant 0 : i32
    %c0_i32_1 = arith.constant 0 : i32
    return %c0_i32, %c0_i32_0 : i32, i32
  }
  func.func @transform_17(%arg0: i32) -> (i32, i32) {
    %c0_i32 = arith.constant 0 : i32
    %c0_i32_0 = arith.constant 0 : i32
    %c0_i32_1 = arith.constant 0 : i32
    return %c0_i32, %c0_i32_0 : i32, i32
  }
  func.func @transform_18(%arg0: i32) -> (i32, i32, i32) {
    %c0_i32 = arith.constant 0 : i32
    %c0_i32_0 = arith.constant 0 : i32
    %c0_i32_1 = arith.constant 0 : i32
    return %arg0, %c0_i32, %c0_i32_0 : i32, i32, i32
  }
  func.func @transform_19(%arg0: i32) -> (i32, i32, i32) {
    %c0_i32 = arith.constant 0 : i32
    %c0_i32_0 = arith.constant 0 : i32
    %c0_i32_1 = arith.constant 0 : i32
    return %arg0, %c0_i32, %c0_i32_0 : i32, i32, i32
  }
}

</mosaic_0001>

<bundles_post_ra>
// kernel: gae_forward.1
= control target key start
LH: loop header
LB: loop body
LE: loop exit
PB: predicated region body
PF: predicated region fallthrough
CT: control target
= control target key end

     0   :  { %s3696_s0 = inlined_call_operand.vmem [shape: bf16[2,16,16], index: 0, kind: input, shape index: {}]   ;;  %s3697_s1 = inlined_call_operand.vmem [shape: bf16[2,32,16], index: 1, kind: input, shape index: {}]   ;;  %s3698_s2 = inlined_call_operand.vmem [shape: bf16[32,32], index: 2, kind: input, shape index: {}]   ;;  %s3699_s3 = inlined_call_operand.vmem [shape: f32[32,1], index: 3, kind: input, shape index: {}]   ;;  %s3700_s4 = inlined_call_operand.vmem [shape: f32[32,16], index: 4, kind: input, shape index: {}]   ;;  %s3701_s5 = inlined_call_operand.vmem [shape: bf16[3,32,32], index: 5, kind: input, shape index: {}]   ;;  %s3702_s6 = inlined_call_operand.vmem [shape: f32[32,1], index: 6, kind: input, shape index: {}]   ;;  %s3703_s7 = inlined_call_operand.vmem [shape: f32[32,1], index: 7, kind: input, shape index: {}]   ;;  %s3704_s8 = inlined_call_operand.vmem [shape: bf16[3,32,32], index: 8, kind: input, shape index: {}]   ;;  %s3705_s9 = inlined_call_operand.vmem [shape: f32[32,1], index: 9, kind: input, shape index: {}]   ;;  %s3706_s10 = inlined_call_operand.vmem [shape: f32[32,1], index: 10, kind: input, shape index: {}]   ;;  %s3707_s11 = inlined_call_operand.vmem [shape: bf16[3,32,32], index: 11, kind: input, shape index: {}]   ;;  %s3708_s12 = inlined_call_operand.vmem [shape: f32[32,1], index: 12, kind: input, shape index: {}]   ;;  %s3709_s13 = inlined_call_operand.vmem [shape: f32[32,1], index: 13, kind: input, shape index: {}]   ;;  %s3710_s14 = inlined_call_operand.vmem [shape: bf16[48,32], index: 14, kind: input, shape index: {}]   ;;  %s3711_s15 = inlined_call_operand.vmem [shape: bf16[48,32], index: 15, kind: input, shape index: {}]   ;;  %s3712_s16 = inlined_call_operand.vmem [shape: bf16[48,32], index: 16, kind: input, shape index: {}]   ;;  %s3713_s17 = inlined_call_operand.vmem [shape: f32[32,1], index: 17, kind: input, shape index: {}]   ;;  %s3714_s18 = inlined_call_operand.hbm [shape: f32[2,16,16], index: 18, kind: output, shape index: {0}]   ;;  %s3715_s19 = inlined_call_operand.vmem [shape: f32[2,32,16], index: 19, kind: output, shape index: {1}]  }
   0x1   :  { %3730 = sst [smem:[#allocation14_spill]] %s3696_s0 }
   0x2   :  { %3731 = sst [smem:[#allocation15_spill]] %s3697_s1 }
   0x3   :  { %3732 = sst [smem:[#allocation16_spill]] %s3698_s2 }
   0x4   :  { %3733 = sst [smem:[#allocation17_spill]] %s3699_s3 }
   0x5   :  { %3734 = sst [smem:[#allocation18_spill]] %s3712_s16 }
   0x6   :  { %3735 = sst [smem:[#allocation19_spill]] %s3714_s18 }
   0x7   :  { %3736 = sst [smem:[#allocation20_spill]] %s3715_s19 }
   0x8   :  { %25 = vsyncpa [#allocation3], 0 }
   0x9   :  { %27 = vsyncpa [#allocation3 + $0x1], 0  ;;  %s3220_s0 = smov 0   ;;  %s3222_s30 = smov 0  }
   0xa   :  { %s3224_s20 = smov 0   ;;  %s3226_s21 = smov 0  }
   0xb LB: > { %3737 = sst [smem:[#allocation5_spill]] %s3100_s0  ;;  %s3241_s1 = sadd.s32 4294967295, %s3112_s21   ;;  %s3112_s21 = sphi %s3226_s21, %s3762_s21   ;;  %s3108_s20 = sphi %s3224_s20, %s3765_s20   ;;  %s3104_s30 = sphi %s3222_s30, %s3764_s30   ;;  %s3100_s0 = sphi %s3220_s0, %s3763_s0  }
   0xc   : > { %3738 = sst [smem:[#allocation6_spill]] %s3104_s30  ;;  %s2560_s22 = sadd.s32 4294967294, %s3112_s21  }
   0xd   : > { %3739 = sst [smem:[#allocation7_spill]] %s3108_s20  ;;  %s3245_s2 = sadd.s32 1, %s3112_s21  }
   0xe   : > { %3740 = sst [smem:[#allocation8_spill]] %s3112_s21  ;;  %s428_s23 = sadd.s32 1, %s3108_s20 }
   0xf   : > { %3741 = sst [smem:[#allocation9_spill]] %s3241_s1  ;;  %s425_s24 = ssub.s32 %s3112_s21, %s3245_s2 }
  0x10   : > { %3742 = sst [smem:[#allocation10_spill]] %s3245_s2  ;;  %p438_p0 = scmp.ne.s32.totalorder %s3108_s20, %s3104_s30 }
  0x11   : > { %p426_p1 = scmp.eq.s32.totalorder %s425_s24, 0  ;;  %p439_p2 = scmp.eq.s32.totalorder %s3241_s1, 1 }
  0x12   : > { %p444_p3 = scmp.ne.s32.totalorder %s3104_s30, %s3100_s0  ;;  %p445_p4 = scmp.eq.s32.totalorder %s2560_s22, 1 }
  0x13   : > { %s3256_s25 = scalar_select %p426_p1, %s3108_s20, %s428_s23  }
  0x14   : > { %p3258_p5 = por %p439_p2, %p438_p0  ;;  %p3262_p6 = por %p445_p4, %p444_p3 }
  0x15   : > { %3743 = sst [smem:[#allocation11_spill]] %s3256_s25  ;;  %p2563_p7 = scmp.ge.s32.totalorder %s3112_s21, 1 }
  0x16   : > { %s3744_s3 = scalar_select %p3258_p5, 1, 0 }
  0x17   : > { %s3746_s26 = scalar_select %p3262_p6, 1, 0 }
  0x18   : > { %3745 = sst [smem:[#allocation12_spill]] %s3744_s3  ;;  %p553_p8 = scmp.lt.s32.totalorder %s3112_s21, 3 }
  0x19   : > { %3747 = sst [smem:[#allocation13_spill]] %s3746_s26 }
  0x1a   : > { %p554_p9 = pnand %p2563_p7, %p553_p8 }
  0x1b   : > { %p619_p10 = scmp.lt.s32.totalorder (!%p554_p9), %s3241_s1, 1  ;;  %s3748_s29 = sld [smem:[#allocation16_spill]] (!%p554_p9)  ;;  %vm705_vm0 = vcmask (!%p554_p9), 261120   ;;  %v3114_v2 = vmov (!%p554_p9), 0   ;;  %v1129_v9 = vld [vmem:[%s3702_s6 + $0x8] sm:$0xff] (!%p554_p9)  ;;  %v1128_v10 = vld [vmem:[%s3702_s6] sm:$0xff] (!%p554_p9) }
  0x1c   : > { %557 = sbr.rel (%p554_p9) target bundleno = 2917 (0xb65), region = 92  ;;  %s3749_s25 = sld [smem:[#allocation17_spill]] (!%p554_p9)  ;;  %3000 = vset.pattern.permute.xlu1 (!%p554_p9), %v3114_v2  ;;  %2999 = vset.pattern.permute.xlu0 (!%p554_p9), %v3114_v2  ;;  %v1131_v12 = vld [vmem:[%s3702_s6 + $0x18] sm:$0xff] (!%p554_p9)  ;;  %v1130_v13 = vld [vmem:[%s3702_s6 + $0x10] sm:$0xff] (!%p554_p9)  ;;  %v1157_v14 = vld [vmem:[%s3703_s7 + $0x8] sm:$0xff] (!%p554_p9)  ;;  %vm643_vm1 = vcmask (!%p554_p9), 130048  }
  0x1d   : > { %s3750_s21 = sld [smem:[#allocation14_spill]] (!%p554_p9)  ;;  %s3751_s3 = sld [smem:[#allocation15_spill]] (!%p554_p9)  ;;  %v1156_v15 = vld [vmem:[%s3703_s7] sm:$0xff] (!%p554_p9)  ;;  %v1159_v16 = vld [vmem:[%s3703_s7 + $0x18] sm:$0xff] (!%p554_p9)  ;;  %v1158_v17 = vld [vmem:[%s3703_s7 + $0x10] sm:$0xff] (!%p554_p9)  ;;  %vm3116_vm2 = vmmov (!%p554_p9), 0  }
  0x1e   : > { %v1544_v18 = vld [vmem:[%s3705_s9 + $0x8] sm:$0xff] (!%p554_p9)  ;;  %v1543_v19 = vld [vmem:[%s3705_s9] sm:$0xff] (!%p554_p9)  ;;  %v1546_v20 = vld [vmem:[%s3705_s9 + $0x18] sm:$0xff] (!%p554_p9)  ;;  %s3752_s28 = sld [smem:[#allocation18_spill]] (!%p554_p9)  ;;  %s3753_s16 = sld [smem:[#allocation20_spill]] (!%p554_p9) }
  0x1f   : > { %v1545_v21 = vld [vmem:[%s3705_s9 + $0x10] sm:$0xff] (!%p554_p9)  ;;  %v1572_v22 = vld [vmem:[%s3706_s10 + $0x8] sm:$0xff] (!%p554_p9)  ;;  %v1571_v23 = vld [vmem:[%s3706_s10] sm:$0xff] (!%p554_p9)  ;;  %s3754_s30 = sld [smem:[#allocation6_spill]] (!%p554_p9) }
  0x20   : > { %v1574_v24 = vld [vmem:[%s3706_s10 + $0x18] sm:$0xff] (!%p554_p9)  ;;  %v1573_v25 = vld [vmem:[%s3706_s10 + $0x10] sm:$0xff] (!%p554_p9)  ;;  %v2121_v26 = vld [vmem:[%s3708_s12 + $0x8] sm:$0xff] (!%p554_p9) }
  0x21   : > { %v3004_v0 = vld [vmem:[%s3748_s29] sm:$0xff] (!%p554_p9)   ;;  %v3005_v11 = vld [vmem:[%s3748_s29 + $0x8] sm:$0xff] (!%p554_p9)   ;;  %v2123_v30 = vld [vmem:[%s3708_s12 + $0x18] sm:$0xff] (!%p554_p9) }
  0x22   : > { %v661_v1 = vld [vmem:[%s3749_s25 + $0x10] sm:$0xff] (!%p554_p9)  ;;  %2757 = vmatprep.mubr.msk.bf16.mxu0 (!%p554_p9), %vm705_vm0, %v3004_v0  ;;  %v659_v3 = vld [vmem:[%s3749_s25] sm:$0xff] (!%p554_p9)  ;;  %v662_v4 = vld [vmem:[%s3749_s25 + $0x18] sm:$0xff] (!%p554_p9) }
  0x23   : > { %s3273_s22 = scalar_select %p619_p10, %s3241_s1, 1  ;;  %675 = vperm.xlu1 %3000, %v661_v1   ;;  %665 = vperm.xlu0 %2999, %v659_v3   ;;  %v660_v5 = vld [vmem:[%s3749_s25 + $0x8] sm:$0xff]  ;;  %v2120_v27 = vld [vmem:[%s3708_s12] sm:$0xff]  ;;  %v2122_v31 = vld [vmem:[%s3708_s12 + $0x10] sm:$0xff] }
  0x24   : > { %v2149_v28 = vld [vmem:[%s3709_s13 + $0x8] sm:$0xff]  ;;  %v2148_v29 = vld [vmem:[%s3709_s13] sm:$0xff]  ;;  %v2151_v32 = vld [vmem:[%s3709_s13 + $0x18] sm:$0xff] }
  0x25   : > { %s2674_s26 = sshll.u32 %s3273_s22, 3  ;;  %s2675_s27 = sshll.u32 %s3273_s22, 4  ;;  %v2150_v33 = vld [vmem:[%s3709_s13 + $0x10] sm:$0xff]  ;;  %v2275_v34 = vld [vmem:[%s3713_s17] sm:$0xff]  ;;  %v2276_v35 = vld [vmem:[%s3713_s17 + $0x8] sm:$0xff] }
  0x26   : > { %s623_s18 = scalar_lea.vmem %s3750_s21, %s2674_s26  ;;  %s628_s1 = scalar_lea.vmem %s3751_s3, %s2675_s27  ;;  %v2277_v36 = vld [vmem:[%s3713_s17 + $0x10] sm:$0xff]  ;;  %v2278_v37 = vld [vmem:[%s3713_s17 + $0x18] sm:$0xff]  ;;  %v765_v60 = vld [vmem:[%s3700_s4] sm:$0xff] }
  0x27   : > { %v3296_v6 = vld [vmem:[%s623_s18] sm:$0xff]   ;;  %v3003_v8 = vld [vmem:[%s628_s1 + $0x8] sm:$0xff]   ;;  %680 = vperm.xlu1 %3000, %v662_v4   ;;  %670 = vperm.xlu0 %2999, %v660_v5   ;;  %v767_v63 = vld [vmem:[%s3700_s4 + $0x10] sm:$0xff]  ;;  %s2676_s21 = sshll.u32 %s3273_s22, 5  ;;  %s3755_s22 = sld [smem:[#allocation9_spill]] }
  0x28   : > { %v3001_v7 = vld [vmem:[%s628_s1] sm:$0xff]   ;;  %2761 = vmatprep.subr.bf16.mxu1 %v3296_v6  ;;  %v641_v38 = vunpack.c.l.bf16 %v3296_v6  ;;  %v642_v39 = vunpack.c.h.bf16 %v3296_v6  ;;  %v768_v1 = vld [vmem:[%s3700_s4 + $0x18] sm:$0xff]  ;;  %v766_v4 = vld [vmem:[%s3700_s4 + $0x8] sm:$0xff]  ;;  %s633_s18 = scalar_lea.vmem %s3753_s16, %s2676_s21  ;;  %s609_s1 = sand.u32 1, %s3754_s30  }
  0x29   : > { %2753 = vmatprep.subr.bf16.mxu0 %v3001_v7  ;;  %2762 = vmatpush3.bf16.msra.mxu1 %v3296_v6  ;;  %s2564_s3 = sshll.u32 %s609_s1, 4  ;;  %s3757_s21 = sld [smem:[#allocation19_spill]] }
  0x2a   : > { %2754 = vmatpush3.bf16.msra.mxu0 %v3001_v7  ;;  %2767 = vmatprep.subr.bf16.mxu1 %v3296_v6  ;;  %v644_v40 = vsel %vm643_vm1, %v641_v38, 0.0  ;;  %v645_v41 = vsel %vm643_vm1, %v642_v39, 0.0  ;;  %s611_s23 = scalar_lea.vmem [#allocation2], %s2564_s3  ;;  %s3655_s16 = scalar_lea.sflag [#allocation3], %s609_s1 }
  0x2b   : > { %2755 = vmatprep.subr.bf16.mxu0 %v3003_v8  ;;  %1139 = vperm.xlu1 %3000, %v1129_v9   ;;  %v646_v42 = vadd.f32 %v645_v41, %v644_v40  ;;  %v3007_v41 = vld [vmem:[%s3701_s5 + $0x18] sm:$0xff]   ;;  %s2458_s24 = sshll.u32 %s611_s23, 4  ;;  %s3117_s30 = smov [#allocation2]   ;;  %s3651_s24 = int_to_ptr.vmem [resolvable:$true] %s2458_s24 }
  0x2c   : > { %1134 = vperm.xlu0 %2999, %v1128_v10  }
  0x2d   : > { %v647_v43 = vrot.slane %v646_v42, 4  ;;  %s2677_s27 = sshll.u32 %s3755_s22, 8  ;;  %s3054_s22 = sshll.u32 %s3117_s30, 4  ;;  %s3055_s22 = int_to_ptr.vmem [resolvable:$false] %s3054_s22 }
  0x2e   : > { %2756 = vmatpush3.bf16.msra.mxu0 %v3003_v8  ;;  %s3056_s3 = scalar_lea.vmem %s3055_s22, 512  ;;  %p3057_p0 = scmp.lt.s32.totalorder %s3651_s24, %s3055_s22 }
  0x2f   : > { %1149 = vperm.xlu1 %3000, %v1131_v12   ;;  %v648_v44 = vadd.f32 %v647_v43, %v646_v42  ;;  %v3008_v42 = vld [vmem:[%s3701_s5] sm:$0xff]   ;;  %v3009_v43 = vld [vmem:[%s3701_s5 + $0x8] sm:$0xff]   ;;  %s3758_s2 = smov %s3757_s21  ;;  %s3649_s19 = scalar_lea.hbm %s3757_s21, %s2677_s27 }
  0x30   : > { %1144 = vperm.xlu0 %2999, %v1130_v13  }
  0x31   : > { %2758 = vmatmul.mubr.msk.bf16.vlgmr.msra.gmra.mrb[0].mxu0 %vm705_vm0, %v3005_v11  ;;  %v649_v45 = vrot.slane %v648_v44, 2 }
  0x33   : > { %1167 = vperm.xlu1 %3000, %v1157_v14   ;;  %v650_v46 = vadd.f32 %v649_v45, %v648_v44  ;;  %v3010_v44 = vld [vmem:[%s3701_s5 + $0x20] sm:$0xff]  }
  0x34   : > { %1162 = vperm.xlu0 %2999, %v1156_v15  }
  0x35   : > { %v651_v47 = vrot.slane %v650_v46, 1 }
  0x37   : > { %1177 = vperm.xlu1 %3000, %v1159_v16   ;;  %v652_v48 = vadd.f32 %v651_v47, %v650_v46 }
  0x38   : > { %1172 = vperm.xlu0 %2999, %v1158_v17  }
  0x39   : > { %v653_v49 = vadd.f32 1.0, %v652_v48 }
  0x3b   : > { %1554 = vperm.xlu1 %3000, %v1544_v18   ;;  %3034 = vrsqrt.f32 %v653_v49 }
  0x3c   : > { %1549 = vperm.xlu0 %2999, %v1543_v19  }
  0x3f   : > { %1564 = vperm.xlu1 %3000, %v1546_v20   ;;  %v3006_v20 = vld [vmem:[%s3701_s5 + $0x10] sm:$0xff]  }
  0x40   : > { %1559 = vperm.xlu0 %2999, %v1545_v21   ;;  %2777 = vmatprep.mubr.msk.bf16.mxu0 %vm705_vm0, %v3006_v20 }
  0x43   : > { %1582 = vperm.xlu1 %3000, %v1572_v22  }
  0x44   : > { %1577 = vperm.xlu0 %2999, %v1571_v23  }
  0x45   : > { %v3405_v8 = vpop.eup %3034 }
  0x47   : > { %1592 = vperm.xlu1 %3000, %v1574_v24  }
  0x48   : > { %1587 = vperm.xlu0 %2999, %v1573_v25  }
  0x4b   : > { %2131 = vperm.xlu1 %3000, %v2121_v26  }
  0x4c   : > { %2126 = vperm.xlu0 %2999, %v2120_v27  }
  0x4f   : > { %2159 = vperm.xlu1 %3000, %v2149_v28  }
  0x50   : > { %2154 = vperm.xlu0 %2999, %v2148_v29  }
  0x53   : > { %2141 = vperm.xlu1 %3000, %v2123_v30  }
  0x54   : > { %2136 = vperm.xlu0 %2999, %v2122_v31  }
  0x57   : > { %2169 = vperm.xlu1 %3000, %v2151_v32  }
  0x58   : > { %2164 = vperm.xlu0 %2999, %v2150_v33  }
  0x5b   : > { %2281 = vperm.xlu1 %3000, %v2275_v34  }
  0x5f   : > { %2286 = vperm.xlu1 %3000, %v2276_v35  }
  0x63   : > { %2291 = vperm.xlu1 %3000, %v2277_v36  }
  0x67   : > { %2296 = vperm.xlu1 %3000, %v2278_v37  }
  0xa2   : > { %v676_v50 = vpop.permute.xlu1 %675  ;;  %v666_v51 = vpop.permute.xlu0 %665 }
  0xa6   : > { %v681_v55 = vpop.permute.xlu1 %680  ;;  %v671_v58 = vpop.permute.xlu0 %670 }
 0x104   : > { %v2759_v52 = vpop.f32.mrb[0].mxu0 }
 0x105   : > { %v755_v53 = vadd.f32 %v2759_v52, %v676_v50  ;;  %v746_v54 = vpop.f32.mrb[1].mxu0 }
 0x106   : > { %v747_v56 = vadd.f32 %v746_v54, %v666_v51  ;;  %v2760_v57 = vpop.f32.mrb[2].mxu0 }
 0x107   : > { %v763_v59 = vmax.f32 %v755_v53, 0.0  ;;  %v758_v61 = vadd.f32 %v2760_v57, %v681_v55  ;;  %v749_v62 = vpop.f32.mrb[3].mxu0 }
 0x108   : > { %v761_v0 = vmax.f32 %v747_v56, 0.0  ;;  %v750_v2 = vadd.f32 %v749_v62, %v671_v58 }
 0x109   : > { %v764_v3 = vmax.f32 %v758_v61, 0.0  ;;  %v771_v9 = vadd.f32 %v767_v63, %v763_v59  ;;  %v3011_v59 = vld [vmem:[%s3701_s5 + $0x28] sm:$0xff]   ;;  %v1140_v61 = vpop.permute.xlu1 %1139 }
 0x10a   : > { %v769_v5 = vadd.f32 %v765_v60, %v761_v0  ;;  %v762_v7 = vmax.f32 %v750_v2, 0.0  ;;  %v1135_v60 = vpop.permute.xlu0 %1134 }
 0x10b   : > { %v772_v10 = vadd.f32 %v768_v1, %v764_v3  ;;  %v777_v17 = vmul.f32 %v3405_v8, %v771_v9 }
 0x10c   : > { %v770_v11 = vadd.f32 %v766_v4, %v762_v7  ;;  %v775_v14 = vmul.f32 %v3405_v8, %v769_v5 }
 0x10d   : > { %v778_v12 = vmul.f32 %v3405_v8, %v772_v10  ;;  %v774_v13 = vpack.c.bf16 %v772_v10, %v771_v9  ;;  %v1150_v63 = vpop.permute.xlu1 %1149 }
 0x10e   : > { %v776_v15 = vmul.f32 %v3405_v8, %v770_v11  ;;  %v773_v16 = vpack.c.bf16 %v770_v11, %v769_v5  ;;  %v1145_v62 = vpop.permute.xlu0 %1144 }
 0x10f   : > { %v780_v19 = vpack.c.bf16 %v778_v12, %v777_v17 }
 0x110   : > { %v779_v18 = vpack.c.bf16 %v776_v15, %v775_v14 }
 0x111   : > { %v1168_v1 = vpop.permute.xlu1 %1167 }
 0x112   : > { %2763 = vmatprep.mubr.msk.bf16.mxu1 %vm643_vm1, %v779_v18  ;;  %v1163_v0 = vpop.permute.xlu0 %1162 }
 0x113   : > { %2764 = vmatmul.mubr.msk.bf16.vlgmr.msra.gmra.mrb[0].mxu1 %vm643_vm1, %v780_v19 }
 0x114   : > { %2768 = vmatpush3.bf16.msra.mxu1 %v3296_v6 }
 0x115   : > { %2797 = vmatprep.subr.bf16.mxu1 %v3296_v6 }
 0x116   : > { %v1173_v5 = vpop.permute.xlu0 %1172 }
 0x1e6   : > { %v2765_v21 = vpop.f32.mrb[0].mxu1 }
 0x1e7   : > { %v836_v22 = vadd.f32 %v2765_v21, %v777_v17  ;;  %v827_v23 = vpop.f32.mrb[1].mxu1 }
 0x1e8   : > { %v828_v24 = vadd.f32 %v827_v23, %v775_v14  ;;  %v2766_v25 = vpop.f32.mrb[2].mxu1 }
 0x1e9   : > { %v839_v26 = vadd.f32 %v2766_v25, %v778_v12  ;;  %v830_v27 = vpop.f32.mrb[3].mxu1  ;;  %v844_v30 = vmul.f32 %v3405_v8, %v836_v22 }
 0x1ea   : > { %v842_v28 = vmul.f32 %v3405_v8, %v828_v24  ;;  %v831_v29 = vadd.f32 %v830_v27, %v776_v15 }
 0x1eb   : > { %v845_v31 = vmul.f32 %v3405_v8, %v839_v26  ;;  %v848_v38 = vmul.f32 %v3405_v8, %v844_v30 }
 0x1ec   : > { %v843_v32 = vmul.f32 %v3405_v8, %v831_v29  ;;  %v846_v35 = vmul.f32 %v3405_v8, %v842_v28 }
 0x1ed   : > { %v849_v33 = vmul.f32 %v3405_v8, %v845_v31  ;;  %v921_v34 = vpack.c.bf16 %v845_v31, %v844_v30 }
 0x1ee   : > { %v847_v36 = vmul.f32 %v3405_v8, %v843_v32  ;;  %v920_v37 = vpack.c.bf16 %v843_v32, %v842_v28 }
 0x1ef   : > { %v851_v40 = vpack.c.bf16 %v849_v33, %v848_v38 }
 0x1f0   : > { %v850_v39 = vpack.c.bf16 %v847_v36, %v846_v35  ;;  %2773 = vmatprep.subr.bf16.mxu0 %v920_v37 }
 0x1f1   : > { %2774 = vmatpush3.bf16.msra.mxu0 %v920_v37 }
 0x1f2   : > { %2769 = vmatprep.mubr.msk.bf16.mxu1 %vm643_vm1, %v850_v39  ;;  %2775 = vmatprep.subr.bf16.mxu0 %v921_v34 }
 0x1f3   : > { %2770 = vmatmul.mubr.msk.bf16.vlgmr.msra.gmra.mrb[4].mxu1 %vm643_vm1, %v851_v40 }
 0x1f4   : > { %2798 = vmatpush3.bf16.msra.mxu1 %v3296_v6 }
 0x1f5   : > { %2776 = vmatpush3.bf16.msra.mxu0 %v921_v34  ;;  %2803 = vmatprep.subr.bf16.mxu1 %v3296_v6 }
 0x1f6   : > { %2781 = vmatprep.subr.bf16.mxu0 %v773_v16 }
 0x1f8   : > { %2778 = vmatmul.mubr.msk.bf16.vlgmr.msra.gmra.mrb[4].mxu0 %vm705_vm0, %v3007_v41 }
 0x1f9   : > { %2782 = vmatpush3.bf16.msra.mxu0 %v773_v16  ;;  %2785 = vmatprep.mubr.msk.bf16.mxu0 %vm705_vm0, %v3008_v42 }
 0x1fa   : > { %2783 = vmatprep.subr.bf16.mxu0 %v774_v13 }
 0x1fd   : > { %2784 = vmatpush3.bf16.msra.mxu0 %v774_v13  ;;  %v1178_v13 = vpop.permute.xlu1 %1177 }
 0x204   : > { %2786 = vmatmul.mubr.msk.bf16.vlgmr.msra.gmra.mrb[4].mxu0 %vm705_vm0, %v3009_v43 }
 0x205   : > { %2793 = vmatprep.mubr.msk.bf16.mxu0 %vm705_vm0, %v3010_v44 }
 0x2c6   : > { %v2771_v45 = vpop.f32.mrb[4].mxu1 }
 0x2c7   : > { %v901_v46 = vadd.f32 %v2771_v45, %v848_v38  ;;  %v892_v47 = vpop.f32.mrb[5].mxu1 }
 0x2c8   : > { %v893_v48 = vadd.f32 %v892_v47, %v846_v35  ;;  %v2772_v49 = vpop.f32.mrb[6].mxu1 }
 0x2c9   : > { %v904_v50 = vadd.f32 %v2772_v49, %v849_v33  ;;  %v895_v51 = vpop.f32.mrb[7].mxu1  ;;  %v909_v53 = vmul.f32 %v3405_v8, %v901_v46  ;;  %v3012_v49 = vld [vmem:[%s3704_s8 + $0x10] sm:$0xff]  }
 0x2ca   : > { %v896_v52 = vadd.f32 %v895_v51, %v847_v36  ;;  %v907_v55 = vmul.f32 %v3405_v8, %v893_v48  ;;  %v3013_v51 = vld [vmem:[%s3704_s8 + $0x18] sm:$0xff]  }
 0x2cb   : > { %v910_v54 = vmul.f32 %v3405_v8, %v904_v50 }
 0x2cc   : > { %v908_v56 = vmul.f32 %v3405_v8, %v896_v52  ;;  %v3014_v52 = vld [vmem:[%s3704_s8] sm:$0xff]  }
 0x2cd   : > { %v1058_v57 = vpack.c.bf16 %v910_v54, %v909_v53  ;;  %v3015_v53 = vld [vmem:[%s3704_s8 + $0x8] sm:$0xff]   ;;  %v3016_v54 = vld [vmem:[%s3704_s8 + $0x20] sm:$0xff]  }
 0x2ce   : > { %v1057_v58 = vpack.c.bf16 %v908_v56, %v907_v55 }
 0x2d0   : > { %2789 = vmatprep.subr.bf16.mxu0 %v1057_v58 }
 0x2d1   : > { %2790 = vmatpush3.bf16.msra.mxu0 %v1057_v58 }
 0x2d2   : > { %2791 = vmatprep.subr.bf16.mxu0 %v1058_v57 }
 0x2d5   : > { %2792 = vmatpush3.bf16.msra.mxu0 %v1058_v57 }
 0x2d8   : > { %2794 = vmatmul.mubr.msk.bf16.vlgmr.msra.gmra.mrb[4].mxu0 %vm705_vm0, %v3011_v59 }
 0x3ab   : > { %v2795_v2 = vpop.f32.mrb[4].mxu0 }
 0x3ac   : > { %v1154_v3 = vmul.f32 %v2795_v2, %v1145_v62  ;;  %v1109_v4 = vpop.f32.mrb[5].mxu0 }
 0x3ad   : > { %v1152_v7 = vmul.f32 %v1135_v60, %v1109_v4  ;;  %v2796_v9 = vpop.f32.mrb[6].mxu0 }
 0x3ae   : > { %v1182_v10 = vadd.f32 %v1173_v5, %v1154_v3  ;;  %v1155_v11 = vmul.f32 %v2796_v9, %v1150_v63  ;;  %v1112_v12 = vpop.f32.mrb[7].mxu0  ;;  %v3017_v5 = vld [vmem:[%s3704_s8 + $0x28] sm:$0xff]   ;;  %v1550_v9 = vpop.permute.xlu0 %1549 }
 0x3af   : > { %v1180_v14 = vadd.f32 %v1163_v0, %v1152_v7  ;;  %v1153_v15 = vmul.f32 %v1140_v61, %v1112_v12  ;;  %v3115_v7 = vmov 0.0  }
 0x3b0   : > { %v1183_v16 = vadd.f32 %v1178_v13, %v1155_v11  ;;  %v1186_v19 = vmax.f32 %v1182_v10, 0.0  ;;  %2833 = vmatprep.subr.bf16.mxu0 %v3115_v7  ;;  %2837 = vmatprep.mubr.msk.bf16.mxu0 %vm3116_vm2, %v3115_v7  ;;  %v1555_v10 = vpop.permute.xlu1 %1554 }
 0x3b1   : > { %v1184_v17 = vmax.f32 %v1180_v14, 0.0  ;;  %v1181_v18 = vadd.f32 %v1168_v1, %v1153_v15 }
 0x3b2   : > { %v1187_v20 = vmax.f32 %v1183_v16, 0.0  ;;  %v1198_v27 = vmul.f32 %v3405_v8, %v1186_v19  ;;  %v1560_v11 = vpop.permute.xlu0 %1559 }
 0x3b3   : > { %v1185_v21 = vmax.f32 %v1181_v18, 0.0  ;;  %v1196_v24 = vmul.f32 %v3405_v8, %v1184_v17 }
 0x3b4   : > { %v1199_v22 = vmul.f32 %v3405_v8, %v1187_v20  ;;  %v3456_v23 = vpack.c.bf16 %v1187_v20, %v1186_v19  ;;  %v1565_v12 = vpop.permute.xlu1 %1564 }
 0x3b5   : > { %v1197_v25 = vmul.f32 %v3405_v8, %v1185_v21  ;;  %v3460_v26 = vpack.c.bf16 %v1185_v21, %v1184_v17 }
 0x3b6   : > { %v1201_v29 = vpack.c.bf16 %v1199_v22, %v1198_v27  ;;  %v1578_v13 = vpop.permute.xlu0 %1577 }
 0x3b7   : > { %v1200_v28 = vpack.c.bf16 %v1197_v25, %v1196_v24 }
 0x3b8   : > { %v1583_v14 = vpop.permute.xlu1 %1582 }
 0x3b9   : > { %2799 = vmatprep.mubr.msk.bf16.mxu1 %vm643_vm1, %v1200_v28 }
 0x3ba   : > { %2800 = vmatmul.mubr.msk.bf16.vlgmr.msra.gmra.mrb[8].mxu1 %vm643_vm1, %v1201_v29  ;;  %v1588_v18 = vpop.permute.xlu0 %1587 }
 0x3bb   : > { %2804 = vmatpush3.bf16.msra.mxu1 %v3296_v6 }
 0x48d   : > { %v2801_v30 = vpop.f32.mrb[8].mxu1 }
 0x48e   : > { %v1251_v31 = vadd.f32 %v2801_v30, %v1198_v27  ;;  %v1242_v32 = vpop.f32.mrb[9].mxu1 }
 0x48f   : > { %v1243_v33 = vadd.f32 %v1242_v32, %v1196_v24  ;;  %v2802_v34 = vpop.f32.mrb[10].mxu1 }
 0x490   : > { %v1254_v35 = vadd.f32 %v2802_v34, %v1199_v22  ;;  %v1245_v36 = vpop.f32.mrb[11].mxu1  ;;  %v1259_v39 = vmul.f32 %v3405_v8, %v1251_v31 }
 0x491   : > { %v1257_v37 = vmul.f32 %v3405_v8, %v1243_v33  ;;  %v1246_v38 = vadd.f32 %v1245_v36, %v1197_v25  ;;  %v1593_v25 = vpop.permute.xlu1 %1592 }
 0x492   : > { %v1260_v40 = vmul.f32 %v3405_v8, %v1254_v35  ;;  %v1263_v47 = vmul.f32 %v3405_v8, %v1259_v39 }
 0x493   : > { %v1258_v41 = vmul.f32 %v3405_v8, %v1246_v38  ;;  %v1261_v44 = vmul.f32 %v3405_v8, %v1257_v37 }
 0x494   : > { %v1264_v42 = vmul.f32 %v3405_v8, %v1260_v40  ;;  %v1336_v43 = vpack.c.bf16 %v1260_v40, %v1259_v39 }
 0x495   : > { %v1262_v45 = vmul.f32 %v3405_v8, %v1258_v41  ;;  %v1335_v46 = vpack.c.bf16 %v1258_v41, %v1257_v37 }
 0x496   : > { %v1266_v50 = vpack.c.bf16 %v1264_v42, %v1263_v47 }
 0x497   : > { %v1265_v48 = vpack.c.bf16 %v1262_v45, %v1261_v44  ;;  %2809 = vmatprep.subr.bf16.mxu1 %v1335_v46 }
 0x499   : > { %2805 = vmatprep.mubr.msk.bf16.mxu1 %vm643_vm1, %v1265_v48 }
 0x49a   : > { %2806 = vmatmul.mubr.msk.bf16.vlgmr.msra.gmra.mrb[12].mxu1 %vm643_vm1, %v1266_v50 }
 0x49b   : > { %2810 = vmatpush3.bf16.msra.mxu1 %v1335_v46  ;;  %2813 = vmatprep.mubr.msk.bf16.mxu1 %vm705_vm0, %v3012_v49 }
 0x49c   : > { %2811 = vmatprep.subr.bf16.mxu1 %v1336_v43 }
 0x49f   : > { %2812 = vmatpush3.bf16.msra.mxu1 %v1336_v43  ;;  %v3018_v43 = vld [vmem:[%s3711_s15] sm:$0xff]  }
 0x4a0   : > { %2817 = vmatprep.subr.bf16.mxu1 %v3460_v26 }
 0x4a2   : > { %2814 = vmatmul.mubr.msk.bf16.vlgmr.msra.gmra.mrb[16].mxu1 %vm705_vm0, %v3013_v51 }
 0x4a3   : > { %2818 = vmatpush3.bf16.msra.mxu1 %v3460_v26  ;;  %2821 = vmatprep.mubr.msk.bf16.mxu1 %vm705_vm0, %v3014_v52 }
 0x4a4   : > { %2819 = vmatprep.subr.bf16.mxu1 %v3456_v23 }
 0x4a7   : > { %2820 = vmatpush3.bf16.msra.mxu1 %v3456_v23 }
 0x4ae   : > { %2822 = vmatmul.mubr.msk.bf16.vlgmr.msra.gmra.mrb[16].mxu1 %vm705_vm0, %v3015_v53 }
 0x4af   : > { %2829 = vmatprep.mubr.msk.bf16.mxu1 %vm705_vm0, %v3016_v54 }
 0x56d   : > { %v2807_v55 = vpop.f32.mrb[12].mxu1 }
 0x56e   : > { %v1316_v56 = vadd.f32 %v2807_v55, %v1263_v47  ;;  %v1307_v57 = vpop.f32.mrb[13].mxu1 }
 0x56f   : > { %v1308_v58 = vadd.f32 %v1307_v57, %v1261_v44  ;;  %v2808_v59 = vpop.f32.mrb[14].mxu1 }
 0x570   : > { %v1319_v60 = vadd.f32 %v2808_v59, %v1264_v42  ;;  %v1310_v61 = vpop.f32.mrb[15].mxu1  ;;  %v1324_v63 = vmul.f32 %v3405_v8, %v1316_v56 }
 0x571   : > { %v1311_v62 = vadd.f32 %v1310_v61, %v1262_v45  ;;  %v1322_v1 = vmul.f32 %v3405_v8, %v1308_v58 }
 0x572   : > { %v1325_v0 = vmul.f32 %v3405_v8, %v1319_v60  ;;  %v3019_v60 = vld [vmem:[%s3707_s11 + $0x10] sm:$0xff]  }
 0x573   : > { %v1323_v2 = vmul.f32 %v3405_v8, %v1311_v62  ;;  %v3020_v62 = vld [vmem:[%s3707_s11 + $0x18] sm:$0xff]  }
 0x574   : > { %v1473_v3 = vpack.c.bf16 %v1325_v0, %v1324_v63  ;;  %v3021_v63 = vld [vmem:[%s3707_s11] sm:$0xff]   ;;  %v3022_v0 = vld [vmem:[%s3707_s11 + $0x8] sm:$0xff]  }
 0x575   : > { %v1472_v4 = vpack.c.bf16 %v1323_v2, %v1322_v1  ;;  %v3023_v1 = vld [vmem:[%s3707_s11 + $0x20] sm:$0xff]   ;;  %v3025_v2 = vld [vmem:[%s3711_s15 + $0x8] sm:$0xff]  }
 0x577   : > { %2825 = vmatprep.subr.bf16.mxu1 %v1472_v4 }
 0x578   : > { %2826 = vmatpush3.bf16.msra.mxu1 %v1472_v4  ;;  %v3027_v4 = vld [vmem:[%s3710_s14] sm:$0xff]  }
 0x579   : > { %2827 = vmatprep.subr.bf16.mxu1 %v1473_v3 }
 0x57c   : > { %2828 = vmatpush3.bf16.msra.mxu1 %v1473_v3  ;;  %v3026_v3 = vld [vmem:[%s3711_s15 + $0x10] sm:$0xff]  }
 0x57d   : > { %2865 = vmatprep.subr.bf16.mxu1 %v3296_v6 }
 0x57f   : > { %2830 = vmatmul.mubr.msk.bf16.vlgmr.msra.gmra.mrb[16].mxu1 %vm705_vm0, %v3017_v5  ;;  %v3028_v5 = vld [vmem:[%s3710_s14 + $0x8] sm:$0xff]  }
 0x580   : > { %2866 = vmatpush3.bf16.msra.mxu1 %v3296_v6 }
 0x581   : > { %2871 = vmatprep.subr.bf16.mxu1 %v3296_v6 }
 0x652   : > { %v2831_v15 = vpop.f32.mrb[16].mxu1 }
 0x653   : > { %v1569_v16 = vmul.f32 %v2831_v15, %v1560_v11  ;;  %v1524_v17 = vpop.f32.mrb[17].mxu1 }
 0x654   : > { %v1567_v19 = vmul.f32 %v1550_v9, %v1524_v17  ;;  %v2832_v20 = vpop.f32.mrb[18].mxu1 }
 0x655   : > { %v1597_v21 = vadd.f32 %v1588_v18, %v1569_v16  ;;  %v1570_v22 = vmul.f32 %v2832_v20, %v1565_v12  ;;  %v1527_v24 = vpop.f32.mrb[19].mxu1 }
 0x656   : > { %v1595_v27 = vadd.f32 %v1578_v13, %v1567_v19  ;;  %v1568_v28 = vmul.f32 %v1555_v10, %v1527_v24  ;;  %v3024_v24 = vld [vmem:[%s3707_s11 + $0x28] sm:$0xff]  }
 0x657   : > { %v1598_v29 = vadd.f32 %v1593_v25, %v1570_v22  ;;  %v1601_v32 = vmax.f32 %v1597_v21, 0.0 }
 0x658   : > { %v1599_v30 = vmax.f32 %v1595_v27, 0.0  ;;  %v1596_v31 = vadd.f32 %v1583_v14, %v1568_v28 }
 0x659   : > { %v1602_v33 = vmax.f32 %v1598_v29, 0.0  ;;  %v1775_v40 = vmul.f32 %v3405_v8, %v1601_v32 }
 0x65a   : > { %v1600_v34 = vmax.f32 %v1596_v31, 0.0  ;;  %v1773_v37 = vmul.f32 %v3405_v8, %v1599_v30 }
 0x65b   : > { %v1610_v35 = vpack.c.bf16 %v1602_v33, %v1601_v32  ;;  %v1776_v36 = vmul.f32 %v3405_v8, %v1602_v33 }
 0x65c   : > { %v1609_v38 = vpack.c.bf16 %v1600_v34, %v1599_v30  ;;  %v1774_v39 = vmul.f32 %v3405_v8, %v1600_v34 }
 0x65d   : > { %v1778_v42 = vpack.c.bf16 %v1776_v36, %v1775_v40 }
 0x65e   : > { %v1777_v41 = vpack.c.bf16 %v1774_v39, %v1773_v37  ;;  %2834 = vmatpush3.bf16.msra.mxu0 %v1609_v38 }
 0x65f   : > { %2835 = vmatprep.subr.bf16.mxu0 %v3115_v7 }
 0x660   : > { %2867 = vmatprep.mubr.msk.bf16.mxu1 %vm643_vm1, %v1777_v41  ;;  %v2132_v41 = vpop.permute.xlu1 %2131 }
 0x661   : > { %2868 = vmatmul.mubr.msk.bf16.vlgmr.msra.gmra.mrb[20].mxu1 %vm643_vm1, %v1778_v42 }
 0x662   : > { %2836 = vmatpush3.bf16.msra.mxu0 %v1610_v35  ;;  %2872 = vmatpush3.bf16.msra.mxu1 %v3296_v6 }
 0x663   : > { %2849 = vmatprep.subr.bf16.mxu0 %v3115_v7 }
 0x665   : > { %2838 = vmatmul.mubr.msk.bf16.vlgmr.msra.gmra.mrb[8].mxu0 %vm705_vm0, %v3018_v43  ;;  %v2160_v43 = vpop.permute.xlu1 %2159 }
 0x666   : > { %2850 = vmatpush3.bf16.msra.mxu0 %v3460_v26  ;;  %2841 = vmatprep.mubr.msk.bf16.mxu0 %vm3116_vm2, %v3115_v7 }
 0x667   : > { %2851 = vmatprep.subr.bf16.mxu0 %v3115_v7 }
 0x66a   : > { %2852 = vmatpush3.bf16.msra.mxu0 %v3456_v23 }
 0x66b   : > { %2901 = vmatprep.subr.bf16.mxu0 %v3115_v7 }
 0x66d   : > { %2842 = vmatmul.mubr.msk.bf16.gmra.mrb[12].mxu0 %vm705_vm0, %v3025_v2 }
 0x66e   : > { %2845 = vmatprep.mubr.msk.bf16.mxu0 %vm3116_vm2, %v3115_v7 }
 0x675   : > { %2846 = vmatmul.mubr.msk.bf16.gmra.mrb[16].mxu0 %vm705_vm0, %v3026_v3 }
 0x676   : > { %2853 = vmatprep.mubr.msk.bf16.mxu0 %vm3116_vm2, %v3115_v7 }
 0x67d   : > { %2854 = vmatmul.mubr.msk.bf16.vlgmr.msra.gmra.mrb[8].mxu0 %vm705_vm0, %v3027_v4 }
 0x67e   : > { %2857 = vmatprep.mubr.msk.bf16.mxu0 %vm3116_vm2, %v3115_v7 }
 0x685   : > { %2858 = vmatmul.mubr.msk.bf16.gmra.mrb[20].mxu0 %vm705_vm0, %v3028_v5 }
 0x686   : > { %2861 = vmatprep.mubr.msk.bf16.mxu0 %vm3116_vm2, %v3115_v7 }
 0x734   : > { %v2869_v44 = vpop.f32.mrb[20].mxu1 }
 0x735   : > { %v1828_v45 = vadd.f32 %v2869_v44, %v1775_v40  ;;  %v1819_v46 = vpop.f32.mrb[21].mxu1  ;;  %v2127_v40 = vpop.permute.xlu0 %2126 }
 0x736   : > { %v1820_v47 = vadd.f32 %v1819_v46, %v1773_v37  ;;  %v2870_v6 = vpop.f32.mrb[22].mxu1 }
 0x737   : > { %v1831_v48 = vadd.f32 %v2870_v6, %v1776_v36  ;;  %v1822_v49 = vpop.f32.mrb[23].mxu1  ;;  %v1836_v26 = vmul.f32 %v3405_v8, %v1828_v45  ;;  %v2142_v45 = vpop.permute.xlu1 %2141 }
 0x738   : > { %v1834_v50 = vmul.f32 %v3405_v8, %v1820_v47  ;;  %v1823_v51 = vadd.f32 %v1822_v49, %v1774_v39 }
 0x739   : > { %v1837_v52 = vmul.f32 %v3405_v8, %v1831_v48  ;;  %v1840_v58 = vmul.f32 %v3405_v8, %v1836_v26  ;;  %v2155_v42 = vpop.permute.xlu0 %2154 }
 0x73a   : > { %v1835_v53 = vmul.f32 %v3405_v8, %v1823_v51  ;;  %v1838_v55 = vmul.f32 %v3405_v8, %v1834_v50 }
 0x73b   : > { %v1841_v23 = vmul.f32 %v3405_v8, %v1837_v52  ;;  %v1913_v54 = vpack.c.bf16 %v1837_v52, %v1836_v26 }
 0x73c   : > { %v1839_v56 = vmul.f32 %v3405_v8, %v1835_v53  ;;  %v1912_v57 = vpack.c.bf16 %v1835_v53, %v1834_v50  ;;  %v2170_v53 = vpop.permute.xlu1 %2169 }
 0x73d   : > { %v1843_v61 = vpack.c.bf16 %v1841_v23, %v1840_v58  ;;  %v2137_v44 = vpop.permute.xlu0 %2136 }
 0x73e   : > { %v1842_v59 = vpack.c.bf16 %v1839_v56, %v1838_v55  ;;  %2877 = vmatprep.subr.bf16.mxu1 %v1912_v57 }
 0x740   : > { %2873 = vmatprep.mubr.msk.bf16.mxu1 %vm643_vm1, %v1842_v59  ;;  %v1677_v25 = vpop.f32.mrb[12].mxu0 }
 0x741   : > { %2874 = vmatmul.mubr.msk.bf16.vlgmr.msra.gmra.mrb[24].mxu1 %vm643_vm1, %v1843_v61  ;;  %v2843_v27 = vpop.f32.mrb[13].mxu0  ;;  %v2165_v48 = vpop.permute.xlu0 %2164 }
 0x742   : > { %2878 = vmatpush3.bf16.msra.mxu1 %v1912_v57  ;;  %2881 = vmatprep.mubr.msk.bf16.mxu1 %vm705_vm0, %v3019_v60  ;;  %v1680_v28 = vpop.f32.mrb[14].mxu0 }
 0x743   : > { %2879 = vmatprep.subr.bf16.mxu1 %v1913_v54  ;;  %v2844_v29 = vpop.f32.mrb[15].mxu0 }
 0x746   : > { %2880 = vmatpush3.bf16.msra.mxu1 %v1913_v54 }
 0x747   : > { %2885 = vmatprep.subr.bf16.mxu1 %v1609_v38 }
 0x748   : > { %v1685_v30 = vpop.f32.mrb[16].mxu0 }
 0x749   : > { %2882 = vmatmul.mubr.msk.bf16.vlgmr.msra.gmra.mrb[28].mxu1 %vm705_vm0, %v3020_v62  ;;  %v2847_v31 = vpop.f32.mrb[17].mxu0 }
 0x74a   : > { %2886 = vmatpush3.bf16.msra.mxu1 %v1609_v38  ;;  %2889 = vmatprep.mubr.msk.bf16.mxu1 %vm705_vm0, %v3021_v63  ;;  %v1688_v32 = vpop.f32.mrb[18].mxu0  ;;  %v3030_v63 = vld [vmem:[%s3752_s28] sm:$0xff]  }
 0x74b   : > { %2887 = vmatprep.subr.bf16.mxu1 %v1610_v35  ;;  %v2848_v33 = vpop.f32.mrb[19].mxu0 }
 0x74e   : > { %2888 = vmatpush3.bf16.msra.mxu1 %v1610_v35 }
 0x755   : > { %2890 = vmatmul.mubr.msk.bf16.vlgmr.msra.gmra.mrb[28].mxu1 %vm705_vm0, %v3022_v0  ;;  %v3031_v0 = vld [vmem:[%s3752_s28 + $0x8] sm:$0xff]  }
 0x756   : > { %2897 = vmatprep.mubr.msk.bf16.mxu1 %vm705_vm0, %v3023_v1  ;;  %v3032_v1 = vld [vmem:[%s3752_s28 + $0x10] sm:$0xff]  }
 0x758   : > { %v1758_v34 = vpop.f32.mrb[20].mxu0 }
 0x759   : > { %v1759_v35 = vadd.f32 %v1758_v34, %v1677_v25  ;;  %v2859_v36 = vpop.f32.mrb[21].mxu0 }
 0x75a   : > { %v1761_v37 = vpop.f32.mrb[22].mxu0 }
 0x75b   : > { %v1762_v38 = vadd.f32 %v1761_v37, %v1680_v28  ;;  %v2860_v39 = vpop.f32.mrb[23].mxu0 }
 0x814   : > { %v2875_v9 = vpop.f32.mrb[24].mxu1 }
 0x815   : > { %v1893_v10 = vadd.f32 %v2875_v9, %v1840_v58  ;;  %v1884_v11 = vpop.f32.mrb[25].mxu1 }
 0x816   : > { %v1885_v12 = vadd.f32 %v1884_v11, %v1838_v55  ;;  %v2876_v13 = vpop.f32.mrb[26].mxu1 }
 0x817   : > { %v1896_v14 = vadd.f32 %v2876_v13, %v1841_v23  ;;  %v1887_v15 = vpop.f32.mrb[27].mxu1  ;;  %v1901_v17 = vmul.f32 %v3405_v8, %v1893_v10  ;;  %v2282_v13 = vpop.permute.xlu1 %2281 }
 0x818   : > { %v1888_v16 = vadd.f32 %v1887_v15, %v1839_v56  ;;  %v1899_v19 = vmul.f32 %v3405_v8, %v1885_v12 }
 0x819   : > { %v1902_v18 = vmul.f32 %v3405_v8, %v1896_v14 }
 0x81a   : > { %v1900_v20 = vmul.f32 %v3405_v8, %v1888_v16  ;;  %v3029_v8 = vld [vmem:[%s3710_s14 + $0x10] sm:$0xff]  }
 0x81b   : > { %v2050_v21 = vpack.c.bf16 %v1902_v18, %v1901_v17  ;;  %2862 = vmatmul.mubr.msk.bf16.gmra.mrb[24].mxu0 %vm705_vm0, %v3029_v8 }
 0x81c   : > { %v2049_v22 = vpack.c.bf16 %v1900_v20, %v1899_v19  ;;  %2905 = vmatprep.mubr.msk.bf16.mxu0 %vm3116_vm2, %v3115_v7 }
 0x81e   : > { %2893 = vmatprep.subr.bf16.mxu1 %v2049_v22 }
 0x81f   : > { %2894 = vmatpush3.bf16.msra.mxu1 %v2049_v22 }
 0x820   : > { %2895 = vmatprep.subr.bf16.mxu1 %v2050_v21 }
 0x823   : > { %2896 = vmatpush3.bf16.msra.mxu1 %v2050_v21 }
 0x824   : > { %2917 = vmatprep.subr.bf16.mxu1 %v3115_v7 }
 0x826   : > { %2898 = vmatmul.mubr.msk.bf16.vlgmr.msra.gmra.mrb[28].mxu1 %vm705_vm0, %v3024_v24 }
 0x827   : > { %2919 = vmatprep.mubr.msk.bf16.mxu1 %vm3116_vm2, %v3115_v7 }
 0x8ee   : > { %v1766_v2 = vpop.f32.mrb[24].mxu0 }
 0x8ef   : > { %v1767_v3 = vadd.f32 %v1766_v2, %v1685_v30  ;;  %v2863_v4 = vpop.f32.mrb[25].mxu0 }
 0x8f0   : > { %v1769_v5 = vpop.f32.mrb[26].mxu0 }
 0x8f1   : > { %v1770_v9 = vadd.f32 %v1769_v5, %v1688_v32  ;;  %v2864_v10 = vpop.f32.mrb[27].mxu0 }
 0x8f9   : > { %v2899_v46 = vpop.f32.mrb[28].mxu1 }
 0x8fa   : > { %v2146_v47 = vmul.f32 %v2899_v46, %v2137_v44  ;;  %v2101_v6 = vpop.f32.mrb[29].mxu1 }
 0x8fb   : > { %v2144_v49 = vmul.f32 %v2127_v40, %v2101_v6  ;;  %v2900_v50 = vpop.f32.mrb[30].mxu1 }
 0x8fc   : > { %v2174_v51 = vadd.f32 %v2165_v48, %v2146_v47  ;;  %v2147_v26 = vmul.f32 %v2900_v50, %v2142_v45  ;;  %v2104_v52 = vpop.f32.mrb[31].mxu1 }
 0x8fd   : > { %v2172_v23 = vadd.f32 %v2155_v42, %v2144_v49  ;;  %v2145_v54 = vmul.f32 %v2132_v41, %v2104_v52 }
 0x8fe   : > { %v2175_v55 = vadd.f32 %v2170_v53, %v2147_v26  ;;  %v2178_v57 = vmax.f32 %v2174_v51, 0.0 }
 0x8ff   : > { %v2173_v56 = vadd.f32 %v2160_v43, %v2145_v54  ;;  %v2176_v59 = vmax.f32 %v2172_v23, 0.0 }
 0x900   : > { %v2179_v58 = vmax.f32 %v2175_v55, 0.0 }
 0x901   : > { %v2177_v60 = vmax.f32 %v2173_v56, 0.0 }
 0x902   : > { %v2187_v61 = vpack.c.bf16 %v2179_v58, %v2178_v57 }
 0x903   : > { %v2186_v62 = vpack.c.bf16 %v2177_v60, %v2176_v59 }
 0x905   : > { %2902 = vmatpush3.bf16.msra.mxu0 %v2186_v62 }
 0x906   : > { %2903 = vmatprep.subr.bf16.mxu0 %v3115_v7 }
 0x909   : > { %2904 = vmatpush3.bf16.msra.mxu0 %v2187_v61 }
 0x90c   : > { %2906 = vmatmul.mubr.msk.bf16.vlgmr.msra.gmra.mrb[8].mxu0 %vm705_vm0, %v3030_v63 }
 0x90d   : > { %2909 = vmatprep.mubr.msk.bf16.mxu0 %vm3116_vm2, %v3115_v7 }
 0x914   : > { %2910 = vmatmul.mubr.msk.bf16.gmra.mrb[28].mxu0 %vm705_vm0, %v3031_v0 }
 0x915   : > { %2913 = vmatprep.mubr.msk.bf16.mxu0 %vm3116_vm2, %v3115_v7  ;;  %v2287_v7 = vpop.permute.xlu1 %2286 }
 0x919   : > { %v2292_v22 = vpop.permute.xlu1 %2291 }
 0x91c   : > { %2914 = vmatmul.mubr.msk.bf16.gmra.mrb[32].mxu0 %vm705_vm0, %v3032_v1 }
 0x91d   : > { %v2297_v33 = vpop.permute.xlu1 %2296 }
 0x9df   : > { %v2246_v11 = vpop.f32.mrb[8].mxu0 }
 0x9e0   : > { %2303 = vxpose.xlu0.b32.start [1/2] (short) (narrow) %v2246_v11, 16  ;;  %v2907_v12 = vpop.f32.mrb[9].mxu0 }
 0x9e1   : > { %v2249_v14 = vpop.f32.mrb[10].mxu0 }
 0x9e2   : > { %v2908_v15 = vpop.f32.mrb[11].mxu0 }
 0x9e4   : > { %2304 = vxpose.xlu0.b32.end [2/2] (short) (narrow) %v2249_v14, 16 }
 0x9e7   : > { %v2254_v16 = vpop.f32.mrb[28].mxu0 }
 0x9e8   : > { %v2271_v17 = vadd.f32 %v2254_v16, %v1759_v35  ;;  %v2911_v18 = vpop.f32.mrb[29].mxu0 }
 0x9e9   : > { %v2257_v19 = vpop.f32.mrb[30].mxu0 }
 0x9ea   : > { %v2272_v20 = vadd.f32 %v2257_v19, %v1762_v38  ;;  %v2912_v21 = vpop.f32.mrb[31].mxu0  ;;  %v2299_v29 = vadd.f32 %v2282_v13, %v2271_v17 }
 0x9ec   : > { %v3621_v8 = vadd.f32 %v2287_v7, %v2272_v20  ;;  %v2390_v36 = vsel %vm643_vm1, %v2299_v29, -inf }
 0x9ee   : > { %v2391_v34 = vsel %vm643_vm1, %v3621_v8, -inf }
 0x9ef   : > { %v2262_v24 = vpop.f32.mrb[32].mxu0  ;;  %v2394_v39 = vmax.f32 %v2390_v36, %v2391_v34 }
 0x9f0   : > { %v2273_v25 = vadd.f32 %v2262_v24, %v1767_v3  ;;  %v2915_v27 = vpop.f32.mrb[33].mxu0 }
 0x9f1   : > { %v2265_v28 = vpop.f32.mrb[34].mxu0 }
 0x9f2   : > { %v2301_v30 = vadd.f32 %v2292_v22, %v2273_v25  ;;  %v2274_v31 = vadd.f32 %v2265_v28, %v1770_v9  ;;  %v2916_v32 = vpop.f32.mrb[35].mxu0 }
 0x9f4   : > { %v2302_v35 = vadd.f32 %v2297_v33, %v2274_v31  ;;  %v2392_v37 = vsel %vm643_vm1, %v2301_v30, -inf }
 0x9f6   : > { %v2393_v38 = vsel %vm643_vm1, %v2302_v35, -inf }
 0x9f7   : > { %v2395_v40 = vmax.f32 %v2392_v37, %v2393_v38 }
 0x9f9   : > { %v2396_v41 = vmax.f32 %v2394_v39, %v2395_v40 }
 0x9fb   : > { %v2397_v42 = vrot.slane %v2396_v41, 4 }
 0x9fd   : > { %v2398_v43 = vmax.f32 %v2396_v41, %v2397_v42 }
 0x9ff   : > { %v2399_v44 = vrot.slane %v2398_v43, 2 }
 0xa01   : > { %v2400_v45 = vmax.f32 %v2398_v43, %v2399_v44 }
 0xa03   : > { %v2401_v46 = vrot.slane %v2400_v45, 1 }
 0xa05   : > { %v2402_v47 = vmax.f32 %v2400_v45, %v2401_v46 }
 0xa07   : > { %v2403_v6 = vsub.f32 %v2299_v29, %v2402_v47  ;;  %v2404_v48 = vsub.f32 %v3621_v8, %v2402_v47  ;;  %v2405_v49 = vsub.f32 %v2301_v30, %v2402_v47  ;;  %v2406_v50 = vsub.f32 %v2302_v35, %v2402_v47 }
 0xa09   : > { %v2407_v51 = vmul.f32 1.442695, %v2403_v6  ;;  %v2409_v26 = vmul.f32 1.442695, %v2404_v48  ;;  %v2411_v52 = vmul.f32 1.442695, %v2405_v49 }
 0xa0a   : > { %v2413_v53 = vmul.f32 1.442695, %v2406_v50 }
 0xa0b   : > { %3036 = vpow2.f32 %v2407_v51 }
 0xa0c   : > { %3038 = vpow2.f32 %v2409_v26 }
 0xa0d   : > { %3040 = vpow2.f32 %v2411_v52 }
 0xa0e   : > { %3042 = vpow2.f32 %v2413_v53 }
 0xa15   : > { %v3037_v23 = vpop.eup %3036 }
 0xa16   : > { %v3039_v54 = vpop.eup %3038  ;;  %v2415_v55 = vsel %vm643_vm1, %v3037_v23, 0.0 }
 0xa17   : > { %v3041_v56 = vpop.eup %3040  ;;  %v2416_v57 = vsel %vm643_vm1, %v3039_v54, 0.0 }
 0xa18   : > { %v3043_v58 = vpop.eup %3042  ;;  %v2417_v59 = vadd.f32 %v2416_v57, %v2415_v55  ;;  %v2418_v60 = vsel %vm643_vm1, %v3041_v56, 0.0 }
 0xa19   : > { %v2420_v62 = vsel %vm643_vm1, %v3043_v58, 0.0 }
 0xa1a   : > { %v2419_v61 = vadd.f32 %v2418_v60, %v2417_v59 }
 0xa1c   : > { %v2421_v63 = vadd.f32 %v2420_v62, %v2419_v61 }
 0xa1e   : > { %v2422_v0 = vrot.slane %v2421_v63, 4 }
 0xa20   : > { %v2423_v1 = vadd.f32 %v2422_v0, %v2421_v63 }
 0xa22   : > { %v2424_v2 = vrot.slane %v2423_v1, 2 }
 0xa24   : > { %v2425_v3 = vadd.f32 %v2424_v2, %v2423_v1 }
 0xa26   : > { %v2426_v4 = vrot.slane %v2425_v3, 1 }
 0xa28   : > { %v2427_v5 = vadd.f32 %v2426_v4, %v2425_v3 }
 0xa2a   : > { %3044 = vlog2.f32 %v2427_v5 }
 0xa34   : > { %v3045_v9 = vpop.eup %3044 }
 0xa35   : > { %v2429_v10 = vmul.f32 0.6931472, %v3045_v9 }
 0xa37   : > { %v2430_v11 = vadd.f32 %v2429_v10, %v2402_v47 }
 0xa39   : > { %v2431_v12 = vsub.f32 %v2299_v29, %v2430_v11  ;;  %v2432_v13 = vsub.f32 %v3621_v8, %v2430_v11  ;;  %v2433_v14 = vsub.f32 %v2301_v30, %v2430_v11  ;;  %v2434_v15 = vsub.f32 %v2302_v35, %v2430_v11 }
 0xa3b   : > { %2435 = vst.msk [vmem:[%s633_s18] sm:$0xff] %vm643_vm1, %v2431_v12  ;;  %2436 = vst.msk [vmem:[%s633_s18 + $0x8] sm:$0xff] %vm643_vm1, %v2432_v13 }
 0xa3c   : > { %2437 = vst.msk [vmem:[%s633_s18 + $0x10] sm:$0xff] %vm643_vm1, %v2433_v14  ;;  %2438 = vst.msk [vmem:[%s633_s18 + $0x18] sm:$0xff] %vm643_vm1, %v2434_v15  ;;  %s3050_s18 = scalar_lea.vmem %s3651_s24, 256 }
 0xa3d   : > { %p3051_p11 = scmp.ne.s32.totalorder %s3651_s24, %s3050_s18  ;;  %p3058_p1 = scmp.lt.s32.totalorder %s3056_s3, %s3050_s18 }
 0xa3f   : > { %p3052_p12 = pnand %p3051_p11, %p3258_p5  ;;  %p3059_p2 = por %p3058_p1, %p3057_p0 }
 0xa41   : > { %p3053_p13 = pneg %p3052_p12 }
 0xa43   : > { %p3060_p3 = pnand %p3059_p2, %p3053_p13 }
 0xa60   : > { %v2319_v7 = vpop.trf.xlu0 }
 0xa64   : > { %v2320_v16 = vpop.trf.xlu0 }
 0xa65   : > { %v2335_v17 = vpack.c.bf16 %v2320_v16, %v2319_v7 }
 0xa67   : > { %v2337_v18 = vsel %vm643_vm1, %v2335_v17, 0 }
 0xa68   : > { %2918 = vmatpush3.bf16.xpose.msra.mxu1 %v2337_v18 }
 0xa6f   : > { %2920 = vmatmul.mubr.msk.bf16.vlgmr.msra.gmra.mrb[32].mxu1 %vm643_vm1, %v2335_v17 }
 0xb42   : > { %v2373_v19 = vpop.f32.mrb[32].mxu1 }
 0xb43   : > { %v2380_v20 = vmul.f32 0.5, %v2373_v19  ;;  %v2921_v21 = vpop.f32.mrb[33].mxu1 }
 0xb44   : > { %v2376_v22 = vpop.f32.mrb[34].mxu1 }
 0xb45   : > { %3046 = vtanh.f32 %v2380_v20  ;;  %v2381_v24 = vmul.f32 0.5, %v2376_v22  ;;  %v2922_v8 = vpop.f32.mrb[35].mxu1 }
 0xb47   : > { %3048 = vtanh.f32 %v2381_v24 }
 0xb4f   : > { %v3047_v25 = vpop.eup %3046 }
 0xb50   : > { %v2384_v27 = vmul.f32 0.5, %v3047_v25 }
 0xb51   : > { %v3049_v28 = vpop.eup %3048 }
 0xb52   : > { %v2386_v29 = vadd.f32 0.5, %v2384_v27  ;;  %v2385_v30 = vmul.f32 0.5, %v3049_v28 }
 0xb54   : > { %2388 = vst.msk [vmem:[%s611_s23] sm:$0xff] %vm643_vm1, %v2386_v29  ;;  %v2387_v31 = vadd.f32 0.5, %v2385_v30 }
 0xb56   : > { %2389 = vst.msk [vmem:[%s611_s23 + $0x8] sm:$0xff] %vm643_vm1, %v2387_v31 }
 0xb57   : > { %3063 = shalt.err (!%p3060_p3)
}
 0xb58   : > { %s3064_s1 = scalar_lea.hbm %s3649_s19, 256  ;;  %s3068_s20 = scalar_lea.hbm %s3758_s2, 512 }
 0xb59   : > { %p3065_p4 = scmp.ne.s32.totalorder %s3649_s19, %s3064_s1  ;;  %p3069_p9 = scmp.lt.u32.totalorder %s3649_s19, %s3758_s2 }
 0xb5a   : > { %p3070_p10 = scmp.lt.u32.totalorder %s3068_s20, %s3064_s1  ;;  %p3072_p12 = scmp.lt.u32.totalorder %s3064_s1, %s3649_s19 }
 0xb5b   : > { %p3066_p7 = pnand %p3065_p4, %p3258_p5 }
 0xb5c   : > { %p3071_p11 = por %p3070_p10, %p3069_p9 }
 0xb5d   : > { %p3067_p8 = pneg %p3066_p7 }
 0xb5e   : > { %p3073_p13 = por %p3072_p12, %p3071_p11 }
 0xb60   : > { %p3074_p0 = pnand %p3073_p13, %p3067_p8 }
 0xb62   : > { %3077 = shalt.err (!%p3074_p0)
}
 0xb63   : > { %s3118_s18 = smov 128   ;;  %s3119_s30 = smov 8  }
 0xb64   : > { %2955 = dma.vmem_to_hbm [thread:$0]  (%p3258_p5), %s3651_s24, 256, %s3649_s19, %s3655_s16, %s3118_s18, %s3118_s18, %s3119_s30  }
 0xb65 PF: > { %s3759_s22 = sld [smem:[#allocation8_spill]]  ;;  %s3760_s3 = sld [smem:[#allocation5_spill]] }
 0xb6b   : > { %p2961_p1 = scmp.ge.s32.totalorder %s3759_s22, 2  ;;  %s2476_s23 = sand.u32 1, %s3760_s3  }
 0xb6c   : > { %s2477_s1 = scalar_lea.sflag [#allocation3], %s2476_s23 }
 0xb6d   : > { %p2958_p2 = pnand %p2961_p1, %p3262_p6 }
 0xb6f   : > { %3095 = dma.done.wait (!%p2958_p2), %s2477_s1, 256  }
 0xb70   : > { %3097 = vsyncadd (!%p2958_p2), %s2477_s1, 4294967040  ;;  %s3762_s21 = sld [smem:[#allocation10_spill]]  ;;  %s3763_s0 = sld [smem:[#allocation6_spill]] }
 0xb71   : > { %s3764_s30 = sld [smem:[#allocation7_spill]]  ;;  %s3765_s20 = sld [smem:[#allocation11_spill]] }
 0xb76   : > { %p30_p3 = scmp.ge.s32.totalorder %s3762_s21, 4  }
 0xb78   :  { %32 = sbr.rel (!%p30_p3) target bundleno = 11 (0xb), region = 148 }
 0xb7f   :  { %2490 = vsyncpa [#allocation3], 1 }
 0xb80   :  { %2492 = vsyncpa [#allocation3 + $0x1], 1 }

</bundles_post_ra>
